<compile_context>
chip_gen: v7x
topology: tpu7x:2x2x1
jax: 0.10.0
libtpu: 0.0.40
codegen_flags: <defaults>
</compile_context>

<pallas_src>
import functools

import jax
import jax.numpy as jnp
from jax.experimental import pallas as pl
from jax.experimental.pallas import tpu as pltpu

HEADS = 4  # fixed by the module: GATConv(..., heads=4, concat=True)


# ---------------------------------------------------------------------------
# Fused Pallas kernel: 3 x (GATConv -> *attw -> BN -> ReLU) -> pool -> MLP
# ---------------------------------------------------------------------------
def _gnn_fused_kernel(x_ref, adj_ref, attw_ref,
                      w1_ref, a1_ref, p1_ref,
                      w2_ref, a2_ref, p2_ref,
                      w3_ref, a3_ref, p3_ref,
                      pool_ref, fw1_ref, fb1_ref, fw2_ref, fb2_ref,
                      out_ref, *, heads, feat):
    # Compact adjacency (incl. self-loops), DMA'd once; additive mask built in-kernel.
    adj = adj_ref[...]                                          # [N, N]
    neg_mask = jnp.where(adj > 0.0, 0.0, -1e30).astype(jnp.float32)
    attw = attw_ref[...]                                        # [N, 1] node-type scale

    def gat_bn_relu(x, w_ref, a_ref, p_ref):
        # Node feature transform: [N, Fin] @ [Fin, H*F]  (bf16 MXU, f32 acc)
        h_all = jnp.dot(x.astype(jnp.bfloat16), w_ref[...].astype(jnp.bfloat16),
                        preferred_element_type=jnp.float32)

        # All-head attention scores in one small matmul: [N, H*F] @ [H*F, 2H] -> [N, 2H]
        scores = jnp.dot(h_all.astype(jnp.bfloat16), a_ref[...].astype(jnp.bfloat16),
                         preferred_element_type=jnp.float32)
        scores_t = scores.T                                     # [2H, N] tiny XLU transpose

        # Per-head attention + aggregation (unrolled over 4 heads, no packing matmuls).
        outs = []
        for h in range(heads):
            src_row = scores_t[h:h + 1, :]                      # [1, N]  a_src[j, h]
            dst_col = scores[:, heads + h:heads + h + 1]        # [N, 1]  a_dst[i, h]
            logits = dst_col + src_row                          # [N, N]  edge j -> i
            logits = jnp.maximum(logits, 0.2 * logits)          # LeakyReLU(0.2)
            masked = logits + neg_mask
            m = jnp.max(masked, axis=-1, keepdims=True)         # per-head per-target max
            p = jnp.exp(masked - m)                             # self-loop => row sum >= 1
            inv = pl.reciprocal(jnp.sum(p, axis=-1, keepdims=True), approx=True)  # EUP
            attn = p * inv
            # Aggregation for this head only: [N, N] @ [N, F] -> [N, F]
            outs.append(jnp.dot(attn.astype(jnp.bfloat16),
                                h_all[:, h * feat:(h + 1) * feat].astype(jnp.bfloat16),
                                preferred_element_type=jnp.float32))
        y = jnp.concatenate(outs, axis=1)                       # [N, H*F] concat'd heads

        bias, gamma, beta = p_ref[0:1, :], p_ref[1:2, :], p_ref[2:3, :]
        y = (y + bias) * attw                                   # GATConv bias, node scale

        # BatchNorm (training-mode batch stats): single-pass moments + variance clamp.
        mean = jnp.mean(y, axis=0, keepdims=True)
        msq = jnp.mean(y * y, axis=0, keepdims=True)
        var = jnp.maximum(msq - mean * mean, 0.0)
        y = (y - mean) * jax.lax.rsqrt(var + 1e-5) * gamma + beta
        return jnp.maximum(y, 0.0)                              # ReLU

    x = x_ref[...]
    x = gat_bn_relu(x, w1_ref, a1_ref, p1_ref)
    x = gat_bn_relu(x, w2_ref, a2_ref, p2_ref)
    x = gat_bn_relu(x, w3_ref, a3_ref, p3_ref)

    # global_mean_pool (as matmul) -> fc1 -> ReLU -> fc2
    pooled = jnp.dot(pool_ref[...].astype(jnp.bfloat16), x.astype(jnp.bfloat16),
                     preferred_element_type=jnp.float32)        # [B, H*F]
    hid = jnp.dot(pooled.astype(jnp.bfloat16), fw1_ref[...].astype(jnp.bfloat16),
                  preferred_element_type=jnp.float32) + fb1_ref[...]
    hid = jnp.maximum(hid, 0.0)
    out_ref[...] = jnp.dot(hid.astype(jnp.bfloat16), fw2_ref[...].astype(jnp.bfloat16),
                           preferred_element_type=jnp.float32) + fb2_ref[...]


# ---------------------------------------------------------------------------
# Wrapper: pack small params + call the single fused kernel
# ---------------------------------------------------------------------------
@jax.jit
def gnn_forward(params, x, adj, attw, pool_mat):
    hf = params["conv1"]["w"].shape[1]
    f = hf // HEADS
    eye_h = jnp.eye(HEADS, dtype=jnp.float32)

    def att_mat(c):
        # Block-diagonal attention matrix [H*F, 2H]: cols 0..H-1 = a_src, H..2H-1 = a_dst
        a_s = (c["att_src"][:, :, None] * eye_h[:, None, :]).reshape(HEADS * f, HEADS)
        a_d = (c["att_dst"][:, :, None] * eye_h[:, None, :]).reshape(HEADS * f, HEADS)
        return jnp.concatenate([a_s, a_d], axis=1).astype(jnp.float32)

    args = [x, adj, attw]
    for i in range(1, 4):
        c, b = params[f"conv{i}"], params[f"bn{i}"]
        packed = jnp.concatenate([c["bias"], b["gamma"], b["beta"]], axis=0)   # [3, hf]
        args += [c["w"], att_mat(c), packed]
    args += [pool_mat, params["fc1"]["w"], params["fc1"]["b"],
             params["fc2"]["w"], params["fc2"]["b"]]

    bsz = pool_mat.shape[0]
    out_dim = params["fc2"]["w"].shape[1]
    kernel = functools.partial(_gnn_fused_kernel, heads=HEADS, feat=f)
    vmem = pl.BlockSpec(memory_space=pltpu.MemorySpace.VMEM)
    return pl.pallas_call(
        kernel,
        out_shape=jax.ShapeDtypeStruct((bsz, out_dim), jnp.float32),
        in_specs=[vmem] * len(args),
        out_specs=vmem,
    )(*args)


# ---------------------------------------------------------------------------
# Deterministic parameter init (shapes dictated by the module's __init__)
# ---------------------------------------------------------------------------
def init_params(key, input_dim, hidden_dim, output_dim):
    hf = hidden_dim * HEADS
    keys = jax.random.split(key, 11)

    def g(k, shape, scale=0.1):
        return (scale * jax.random.normal(k, shape)).astype(jnp.float32)

    params = {}
    dims_in = [input_dim, hf, hf]
    for i in range(3):
        params[f"conv{i + 1}"] = dict(
            w=g(keys[3 * i + 0], (dims_in[i], hf)),           # lin weight (no bias)
            att_src=g(keys[3 * i + 1], (HEADS, hidden_dim)),  # a_src per head
            att_dst=g(keys[3 * i + 2], (HEADS, hidden_dim)),  # a_dst per head
            bias=jnp.zeros((1, hf), jnp.float32),             # GATConv output bias
        )
        params[f"bn{i + 1}"] = dict(gamma=jnp.ones((1, hf), jnp.float32),
                                    beta=jnp.zeros((1, hf), jnp.float32))
    params["fc1"] = dict(w=g(keys[9], (hf, hidden_dim)),
                         b=jnp.zeros((1, hidden_dim), jnp.float32))
    params["fc2"] = dict(w=g(keys[10], (hidden_dim, output_dim)),
                         b=jnp.zeros((1, output_dim), jnp.float32))
    return params


# ---------------------------------------------------------------------------
# Main
# ---------------------------------------------------------------------------
if __name__ == "__main__":
    INPUT_DIM, HIDDEN_DIM, OUTPUT_DIM = 8, 8, 1
    NODES_PER_GRAPH, NUM_GRAPHS = 8, 2
    N = NODES_PER_GRAPH * NUM_GRAPHS

    key = jax.random.PRNGKey(0)
    k_params, k_x = jax.random.split(key)

    params = init_params(k_params, INPUT_DIM, HIDDEN_DIM, OUTPUT_DIM)

    # Node features
    x = jax.random.normal(k_x, (N, INPUT_DIM), dtype=jnp.float32)

    # Deterministic edge_index: bidirectional ring within each graph
    edges = []
    for g in range(NUM_GRAPHS):
        base = g * NODES_PER_GRAPH
        for i in range(NODES_PER_GRAPH):
            j = base + (i + 1) % NODES_PER_GRAPH
            edges.append((base + i, j))
            edges.append((j, base + i))
    edge_index = jnp.array(edges, dtype=jnp.int32).T  # [2, E] (src, dst)

    # Dense adjacency adj[dst, src] with self-loops (GATConv add_self_loops=True)
    adj = jnp.zeros((N, N), jnp.float32).at[edge_index[1], edge_index[0]].set(1.0)
    adj = jnp.maximum(adj, jnp.eye(N, dtype=jnp.float32))

    # node_types -> per-node attention weights (1.5 for type 0, else 1.0)
    node_types = jnp.arange(N, dtype=jnp.int32) % 2
    attw = jnp.where(node_types == 0, 1.5, 1.0).astype(jnp.float32)[:, None]  # [N, 1]

    # batch vector -> mean-pooling matrix [B, N]
    batch = jnp.repeat(jnp.arange(NUM_GRAPHS, dtype=jnp.int32), NODES_PER_GRAPH)
    onehot = (batch[None, :] == jnp.arange(NUM_GRAPHS)[:, None]).astype(jnp.float32)
    pool_mat = onehot / jnp.sum(onehot, axis=1, keepdims=True)

    out = gnn_forward(params, x, adj, attw, pool_mat)
    out = jax.block_until_ready(out)

    assert out.shape == (NUM_GRAPHS, OUTPUT_DIM)
    assert bool(jnp.all(jnp.isfinite(out)))
    print("KERNEL_OK")
</pallas_src>

<mosaic_0001>
module attributes {stable_mosaic.version = 11 : i64} {
  func.func @_gnn_fused_kernel(%arg0: memref<16x8xf32, #tpu.memory_space<vmem>>, %arg1: memref<16x16xf32, #tpu.memory_space<vmem>>, %arg2: memref<16x1xf32, #tpu.memory_space<vmem>>, %arg3: memref<8x32xf32, #tpu.memory_space<vmem>>, %arg4: memref<32x8xf32, #tpu.memory_space<vmem>>, %arg5: memref<3x32xf32, #tpu.memory_space<vmem>>, %arg6: memref<32x32xf32, #tpu.memory_space<vmem>>, %arg7: memref<32x8xf32, #tpu.memory_space<vmem>>, %arg8: memref<3x32xf32, #tpu.memory_space<vmem>>, %arg9: memref<32x32xf32, #tpu.memory_space<vmem>>, %arg10: memref<32x8xf32, #tpu.memory_space<vmem>>, %arg11: memref<3x32xf32, #tpu.memory_space<vmem>>, %arg12: memref<2x16xf32, #tpu.memory_space<vmem>>, %arg13: memref<32x8xf32, #tpu.memory_space<vmem>>, %arg14: memref<1x8xf32, #tpu.memory_space<vmem>>, %arg15: memref<8x1xf32, #tpu.memory_space<vmem>>, %arg16: memref<1x1xf32, #tpu.memory_space<vmem>>, %arg17: memref<2x1xf32, #tpu.memory_space<vmem>>) attributes {dimension_semantics = [], scalar_prefetch = 0 : i64, scratch_operands = 0 : i64, tpu.core_type = #tpu.core_type<tc>} {
    %c0 = arith.constant 0 : index
    %c0_0 = arith.constant 0 : index
    %0 = vector.load %arg1[%c0, %c0_0] : memref<16x16xf32, #tpu.memory_space<vmem>>, vector<16x16xf32>
    %cst = arith.constant 0.000000e+00 : f32
    %1 = vector.broadcast %cst : f32 to vector<16x16xf32>
    %2 = arith.cmpf ogt, %0, %1 : vector<16x16xf32>
    %cst_1 = arith.constant 0.000000e+00 : f32
    %cst_2 = arith.constant -1.000000e+30 : f32
    %3 = vector.broadcast %cst_1 : f32 to vector<16x16xf32>
    %4 = vector.broadcast %cst_2 : f32 to vector<16x16xf32>
    %5 = arith.select %2, %3, %4 : vector<16x16xi1>, vector<16x16xf32>
    %c0_3 = arith.constant 0 : index
    %c0_4 = arith.constant 0 : index
    %6 = vector.load %arg2[%c0_3, %c0_4] : memref<16x1xf32, #tpu.memory_space<vmem>>, vector<16x1xf32>
    %c0_5 = arith.constant 0 : index
    %c0_6 = arith.constant 0 : index
    %7 = vector.load %arg0[%c0_5, %c0_6] : memref<16x8xf32, #tpu.memory_space<vmem>>, vector<16x8xf32>
    %8 = arith.truncf %7 : vector<16x8xf32> to vector<16x8xbf16>
    %c0_7 = arith.constant 0 : index
    %c0_8 = arith.constant 0 : index
    %9 = vector.load %arg3[%c0_7, %c0_8] : memref<8x32xf32, #tpu.memory_space<vmem>>, vector<8x32xf32>
    %10 = arith.truncf %9 : vector<8x32xf32> to vector<8x32xbf16>
    %cst_9 = arith.constant dense<0.000000e+00> : vector<16x32xf32>
    %11 = tpu.matmul %8, %10, %cst_9 {dimension_numbers = #tpu.dot_dimension_numbers<[1], [0], [0], [1], [0, 0, 1, 1], [], []>} : vector<16x8xbf16>, vector<8x32xbf16>, vector<16x32xf32> -> vector<16x32xf32>
    %12 = arith.truncf %11 : vector<16x32xf32> to vector<16x32xbf16>
    %c0_10 = arith.constant 0 : index
    %c0_11 = arith.constant 0 : index
    %13 = vector.load %arg4[%c0_10, %c0_11] : memref<32x8xf32, #tpu.memory_space<vmem>>, vector<32x8xf32>
    %14 = arith.truncf %13 : vector<32x8xf32> to vector<32x8xbf16>
    %cst_12 = arith.constant dense<0.000000e+00> : vector<16x8xf32>
    %15 = tpu.matmul %12, %14, %cst_12 {dimension_numbers = #tpu.dot_dimension_numbers<[1], [0], [0], [1], [0, 0, 1, 1], [], []>} : vector<16x32xbf16>, vector<32x8xbf16>, vector<16x8xf32> -> vector<16x8xf32>
    %16 = tpu.transpose %15, [1, 0] : vector<16x8xf32> -> vector<8x16xf32>
    %17 = vector.extract_strided_slice %16 {offsets = [0, 0], sizes = [1, 16], strides = [1, 1]} : vector<8x16xf32> to vector<1x16xf32>
    %18 = vector.extract_strided_slice %15 {offsets = [0, 4], sizes = [16, 1], strides = [1, 1]} : vector<16x8xf32> to vector<16x1xf32>
    %19 = vector.broadcast %18 : vector<16x1xf32> to vector<16x16xf32>
    %20 = vector.broadcast %17 : vector<1x16xf32> to vector<16x16xf32>
    %21 = arith.addf %19, %20 : vector<16x16xf32>
    %cst_13 = arith.constant 2.000000e-01 : f32
    %22 = vector.broadcast %cst_13 : f32 to vector<16x16xf32>
    %23 = arith.mulf %22, %21 : vector<16x16xf32>
    %24 = arith.maximumf %21, %23 : vector<16x16xf32>
    %25 = arith.addf %24, %5 : vector<16x16xf32>
    %cst_14 = arith.constant dense<0xFF800000> : vector<16xf32>
    %26 = vector.multi_reduction <maximumf>, %25, %cst_14 [1] : vector<16x16xf32> to vector<16xf32>
    %27 = vector.shape_cast %26 : vector<16xf32> to vector<16x1xf32>
    %28 = vector.broadcast %27 : vector<16x1xf32> to vector<16x16xf32>
    %29 = arith.subf %25, %28 : vector<16x16xf32>
    %30 = math.exp %29 : vector<16x16xf32>
    %cst_15 = arith.constant dense<0.000000e+00> : vector<16xf32>
    %31 = vector.multi_reduction <add>, %30, %cst_15 [1] : vector<16x16xf32> to vector<16xf32>
    %32 = vector.shape_cast %31 : vector<16xf32> to vector<16x1xf32>
    %33 = tpu.reciprocal %32 {approx = true} : vector<16x1xf32> -> vector<16x1xf32>
    %34 = vector.broadcast %33 : vector<16x1xf32> to vector<16x16xf32>
    %35 = arith.mulf %30, %34 : vector<16x16xf32>
    %36 = arith.truncf %35 : vector<16x16xf32> to vector<16x16xbf16>
    %37 = vector.extract_strided_slice %11 {offsets = [0, 0], sizes = [16, 8], strides = [1, 1]} : vector<16x32xf32> to vector<16x8xf32>
    %38 = arith.truncf %37 : vector<16x8xf32> to vector<16x8xbf16>
    %cst_16 = arith.constant dense<0.000000e+00> : vector<16x8xf32>
    %39 = tpu.matmul %36, %38, %cst_16 {dimension_numbers = #tpu.dot_dimension_numbers<[1], [0], [0], [1], [0, 0, 1, 1], [], []>} : vector<16x16xbf16>, vector<16x8xbf16>, vector<16x8xf32> -> vector<16x8xf32>
    %40 = vector.extract_strided_slice %16 {offsets = [1, 0], sizes = [1, 16], strides = [1, 1]} : vector<8x16xf32> to vector<1x16xf32>
    %41 = vector.extract_strided_slice %15 {offsets = [0, 5], sizes = [16, 1], strides = [1, 1]} : vector<16x8xf32> to vector<16x1xf32>
    %42 = vector.broadcast %41 : vector<16x1xf32> to vector<16x16xf32>
    %43 = vector.broadcast %40 : vector<1x16xf32> to vector<16x16xf32>
    %44 = arith.addf %42, %43 : vector<16x16xf32>
    %cst_17 = arith.constant 2.000000e-01 : f32
    %45 = vector.broadcast %cst_17 : f32 to vector<16x16xf32>
    %46 = arith.mulf %45, %44 : vector<16x16xf32>
    %47 = arith.maximumf %44, %46 : vector<16x16xf32>
    %48 = arith.addf %47, %5 : vector<16x16xf32>
    %cst_18 = arith.constant dense<0xFF800000> : vector<16xf32>
    %49 = vector.multi_reduction <maximumf>, %48, %cst_18 [1] : vector<16x16xf32> to vector<16xf32>
    %50 = vector.shape_cast %49 : vector<16xf32> to vector<16x1xf32>
    %51 = vector.broadcast %50 : vector<16x1xf32> to vector<16x16xf32>
    %52 = arith.subf %48, %51 : vector<16x16xf32>
    %53 = math.exp %52 : vector<16x16xf32>
    %cst_19 = arith.constant dense<0.000000e+00> : vector<16xf32>
    %54 = vector.multi_reduction <add>, %53, %cst_19 [1] : vector<16x16xf32> to vector<16xf32>
    %55 = vector.shape_cast %54 : vector<16xf32> to vector<16x1xf32>
    %56 = tpu.reciprocal %55 {approx = true} : vector<16x1xf32> -> vector<16x1xf32>
    %57 = vector.broadcast %56 : vector<16x1xf32> to vector<16x16xf32>
    %58 = arith.mulf %53, %57 : vector<16x16xf32>
    %59 = arith.truncf %58 : vector<16x16xf32> to vector<16x16xbf16>
    %60 = vector.extract_strided_slice %11 {offsets = [0, 8], sizes = [16, 8], strides = [1, 1]} : vector<16x32xf32> to vector<16x8xf32>
    %61 = arith.truncf %60 : vector<16x8xf32> to vector<16x8xbf16>
    %cst_20 = arith.constant dense<0.000000e+00> : vector<16x8xf32>
    %62 = tpu.matmul %59, %61, %cst_20 {dimension_numbers = #tpu.dot_dimension_numbers<[1], [0], [0], [1], [0, 0, 1, 1], [], []>} : vector<16x16xbf16>, vector<16x8xbf16>, vector<16x8xf32> -> vector<16x8xf32>
    %63 = vector.extract_strided_slice %16 {offsets = [2, 0], sizes = [1, 16], strides = [1, 1]} : vector<8x16xf32> to vector<1x16xf32>
    %64 = vector.extract_strided_slice %15 {offsets = [0, 6], sizes = [16, 1], strides = [1, 1]} : vector<16x8xf32> to vector<16x1xf32>
    %65 = vector.broadcast %64 : vector<16x1xf32> to vector<16x16xf32>
    %66 = vector.broadcast %63 : vector<1x16xf32> to vector<16x16xf32>
    %67 = arith.addf %65, %66 : vector<16x16xf32>
    %cst_21 = arith.constant 2.000000e-01 : f32
    %68 = vector.broadcast %cst_21 : f32 to vector<16x16xf32>
    %69 = arith.mulf %68, %67 : vector<16x16xf32>
    %70 = arith.maximumf %67, %69 : vector<16x16xf32>
    %71 = arith.addf %70, %5 : vector<16x16xf32>
    %cst_22 = arith.constant dense<0xFF800000> : vector<16xf32>
    %72 = vector.multi_reduction <maximumf>, %71, %cst_22 [1] : vector<16x16xf32> to vector<16xf32>
    %73 = vector.shape_cast %72 : vector<16xf32> to vector<16x1xf32>
    %74 = vector.broadcast %73 : vector<16x1xf32> to vector<16x16xf32>
    %75 = arith.subf %71, %74 : vector<16x16xf32>
    %76 = math.exp %75 : vector<16x16xf32>
    %cst_23 = arith.constant dense<0.000000e+00> : vector<16xf32>
    %77 = vector.multi_reduction <add>, %76, %cst_23 [1] : vector<16x16xf32> to vector<16xf32>
    %78 = vector.shape_cast %77 : vector<16xf32> to vector<16x1xf32>
    %79 = tpu.reciprocal %78 {approx = true} : vector<16x1xf32> -> vector<16x1xf32>
    %80 = vector.broadcast %79 : vector<16x1xf32> to vector<16x16xf32>
    %81 = arith.mulf %76, %80 : vector<16x16xf32>
    %82 = arith.truncf %81 : vector<16x16xf32> to vector<16x16xbf16>
    %83 = vector.extract_strided_slice %11 {offsets = [0, 16], sizes = [16, 8], strides = [1, 1]} : vector<16x32xf32> to vector<16x8xf32>
    %84 = arith.truncf %83 : vector<16x8xf32> to vector<16x8xbf16>
    %cst_24 = arith.constant dense<0.000000e+00> : vector<16x8xf32>
    %85 = tpu.matmul %82, %84, %cst_24 {dimension_numbers = #tpu.dot_dimension_numbers<[1], [0], [0], [1], [0, 0, 1, 1], [], []>} : vector<16x16xbf16>, vector<16x8xbf16>, vector<16x8xf32> -> vector<16x8xf32>
    %86 = vector.extract_strided_slice %16 {offsets = [3, 0], sizes = [1, 16], strides = [1, 1]} : vector<8x16xf32> to vector<1x16xf32>
    %87 = vector.extract_strided_slice %15 {offsets = [0, 7], sizes = [16, 1], strides = [1, 1]} : vector<16x8xf32> to vector<16x1xf32>
    %88 = vector.broadcast %87 : vector<16x1xf32> to vector<16x16xf32>
    %89 = vector.broadcast %86 : vector<1x16xf32> to vector<16x16xf32>
    %90 = arith.addf %88, %89 : vector<16x16xf32>
    %cst_25 = arith.constant 2.000000e-01 : f32
    %91 = vector.broadcast %cst_25 : f32 to vector<16x16xf32>
    %92 = arith.mulf %91, %90 : vector<16x16xf32>
    %93 = arith.maximumf %90, %92 : vector<16x16xf32>
    %94 = arith.addf %93, %5 : vector<16x16xf32>
    %cst_26 = arith.constant dense<0xFF800000> : vector<16xf32>
    %95 = vector.multi_reduction <maximumf>, %94, %cst_26 [1] : vector<16x16xf32> to vector<16xf32>
    %96 = vector.shape_cast %95 : vector<16xf32> to vector<16x1xf32>
    %97 = vector.broadcast %96 : vector<16x1xf32> to vector<16x16xf32>
    %98 = arith.subf %94, %97 : vector<16x16xf32>
    %99 = math.exp %98 : vector<16x16xf32>
    %cst_27 = arith.constant dense<0.000000e+00> : vector<16xf32>
    %100 = vector.multi_reduction <add>, %99, %cst_27 [1] : vector<16x16xf32> to vector<16xf32>
    %101 = vector.shape_cast %100 : vector<16xf32> to vector<16x1xf32>
    %102 = tpu.reciprocal %101 {approx = true} : vector<16x1xf32> -> vector<16x1xf32>
    %103 = vector.broadcast %102 : vector<16x1xf32> to vector<16x16xf32>
    %104 = arith.mulf %99, %103 : vector<16x16xf32>
    %105 = arith.truncf %104 : vector<16x16xf32> to vector<16x16xbf16>
    %106 = vector.extract_strided_slice %11 {offsets = [0, 24], sizes = [16, 8], strides = [1, 1]} : vector<16x32xf32> to vector<16x8xf32>
    %107 = arith.truncf %106 : vector<16x8xf32> to vector<16x8xbf16>
    %cst_28 = arith.constant dense<0.000000e+00> : vector<16x8xf32>
    %108 = tpu.matmul %105, %107, %cst_28 {dimension_numbers = #tpu.dot_dimension_numbers<[1], [0], [0], [1], [0, 0, 1, 1], [], []>} : vector<16x16xbf16>, vector<16x8xbf16>, vector<16x8xf32> -> vector<16x8xf32>
    %109 = tpu.concatenate %39, %62, %85, %108 in 1 : vector<16x8xf32>, vector<16x8xf32>, vector<16x8xf32>, vector<16x8xf32> -> vector<16x32xf32>
    %c0_29 = arith.constant 0 : index
    %c0_30 = arith.constant 0 : index
    %110 = vector.load %arg5[%c0_29, %c0_30] : memref<3x32xf32, #tpu.memory_space<vmem>>, vector<1x32xf32>
    %c1 = arith.constant 1 : index
    %c0_31 = arith.constant 0 : index
    %111 = vector.load %arg5[%c1, %c0_31] : memref<3x32xf32, #tpu.memory_space<vmem>>, vector<1x32xf32>
    %c2 = arith.constant 2 : index
    %c0_32 = arith.constant 0 : index
    %112 = vector.load %arg5[%c2, %c0_32] : memref<3x32xf32, #tpu.memory_space<vmem>>, vector<1x32xf32>
    %113 = vector.broadcast %110 : vector<1x32xf32> to vector<16x32xf32>
    %114 = arith.addf %109, %113 : vector<16x32xf32>
    %115 = vector.broadcast %6 : vector<16x1xf32> to vector<16x32xf32>
    %116 = arith.mulf %114, %115 : vector<16x32xf32>
    %cst_33 = arith.constant dense<0.000000e+00> : vector<32xf32>
    %117 = vector.multi_reduction <add>, %116, %cst_33 [0] : vector<16x32xf32> to vector<32xf32>
    %118 = vector.shape_cast %117 : vector<32xf32> to vector<1x32xf32>
    %cst_34 = arith.constant 1.600000e+01 : f32
    %119 = vector.broadcast %cst_34 : f32 to vector<1x32xf32>
    %120 = arith.divf %118, %119 : vector<1x32xf32>
    %121 = arith.mulf %116, %116 : vector<16x32xf32>
    %cst_35 = arith.constant dense<0.000000e+00> : vector<32xf32>
    %122 = vector.multi_reduction <add>, %121, %cst_35 [0] : vector<16x32xf32> to vector<32xf32>
    %123 = vector.shape_cast %122 : vector<32xf32> to vector<1x32xf32>
    %cst_36 = arith.constant 1.600000e+01 : f32
    %124 = vector.broadcast %cst_36 : f32 to vector<1x32xf32>
    %125 = arith.divf %123, %124 : vector<1x32xf32>
    %126 = arith.mulf %120, %120 : vector<1x32xf32>
    %127 = arith.subf %125, %126 : vector<1x32xf32>
    %cst_37 = arith.constant 0.000000e+00 : f32
    %128 = vector.broadcast %cst_37 : f32 to vector<1x32xf32>
    %129 = arith.maximumf %127, %128 : vector<1x32xf32>
    %130 = vector.broadcast %120 : vector<1x32xf32> to vector<16x32xf32>
    %131 = arith.subf %116, %130 : vector<16x32xf32>
    %cst_38 = arith.constant 9.99999974E-6 : f32
    %132 = vector.broadcast %cst_38 : f32 to vector<1x32xf32>
    %133 = arith.addf %129, %132 : vector<1x32xf32>
    %134 = math.rsqrt %133 : vector<1x32xf32>
    %135 = vector.broadcast %134 : vector<1x32xf32> to vector<16x32xf32>
    %136 = arith.mulf %131, %135 : vector<16x32xf32>
    %137 = vector.broadcast %111 : vector<1x32xf32> to vector<16x32xf32>
    %138 = arith.mulf %136, %137 : vector<16x32xf32>
    %139 = vector.broadcast %112 : vector<1x32xf32> to vector<16x32xf32>
    %140 = arith.addf %138, %139 : vector<16x32xf32>
    %cst_39 = arith.constant 0.000000e+00 : f32
    %141 = vector.broadcast %cst_39 : f32 to vector<16x32xf32>
    %142 = arith.maximumf %140, %141 : vector<16x32xf32>
    %143 = arith.truncf %142 : vector<16x32xf32> to vector<16x32xbf16>
    %c0_40 = arith.constant 0 : index
    %c0_41 = arith.constant 0 : index
    %144 = vector.load %arg6[%c0_40, %c0_41] : memref<32x32xf32, #tpu.memory_space<vmem>>, vector<32x32xf32>
    %145 = arith.truncf %144 : vector<32x32xf32> to vector<32x32xbf16>
    %cst_42 = arith.constant dense<0.000000e+00> : vector<16x32xf32>
    %146 = tpu.matmul %143, %145, %cst_42 {dimension_numbers = #tpu.dot_dimension_numbers<[1], [0], [0], [1], [0, 0, 1, 1], [], []>} : vector<16x32xbf16>, vector<32x32xbf16>, vector<16x32xf32> -> vector<16x32xf32>
    %147 = arith.truncf %146 : vector<16x32xf32> to vector<16x32xbf16>
    %c0_43 = arith.constant 0 : index
    %c0_44 = arith.constant 0 : index
    %148 = vector.load %arg7[%c0_43, %c0_44] : memref<32x8xf32, #tpu.memory_space<vmem>>, vector<32x8xf32>
    %149 = arith.truncf %148 : vector<32x8xf32> to vector<32x8xbf16>
    %cst_45 = arith.constant dense<0.000000e+00> : vector<16x8xf32>
    %150 = tpu.matmul %147, %149, %cst_45 {dimension_numbers = #tpu.dot_dimension_numbers<[1], [0], [0], [1], [0, 0, 1, 1], [], []>} : vector<16x32xbf16>, vector<32x8xbf16>, vector<16x8xf32> -> vector<16x8xf32>
    %151 = tpu.transpose %150, [1, 0] : vector<16x8xf32> -> vector<8x16xf32>
    %152 = vector.extract_strided_slice %151 {offsets = [0, 0], sizes = [1, 16], strides = [1, 1]} : vector<8x16xf32> to vector<1x16xf32>
    %153 = vector.extract_strided_slice %150 {offsets = [0, 4], sizes = [16, 1], strides = [1, 1]} : vector<16x8xf32> to vector<16x1xf32>
    %154 = vector.broadcast %153 : vector<16x1xf32> to vector<16x16xf32>
    %155 = vector.broadcast %152 : vector<1x16xf32> to vector<16x16xf32>
    %156 = arith.addf %154, %155 : vector<16x16xf32>
    %cst_46 = arith.constant 2.000000e-01 : f32
    %157 = vector.broadcast %cst_46 : f32 to vector<16x16xf32>
    %158 = arith.mulf %157, %156 : vector<16x16xf32>
    %159 = arith.maximumf %156, %158 : vector<16x16xf32>
    %160 = arith.addf %159, %5 : vector<16x16xf32>
    %cst_47 = arith.constant dense<0xFF800000> : vector<16xf32>
    %161 = vector.multi_reduction <maximumf>, %160, %cst_47 [1] : vector<16x16xf32> to vector<16xf32>
    %162 = vector.shape_cast %161 : vector<16xf32> to vector<16x1xf32>
    %163 = vector.broadcast %162 : vector<16x1xf32> to vector<16x16xf32>
    %164 = arith.subf %160, %163 : vector<16x16xf32>
    %165 = math.exp %164 : vector<16x16xf32>
    %cst_48 = arith.constant dense<0.000000e+00> : vector<16xf32>
    %166 = vector.multi_reduction <add>, %165, %cst_48 [1] : vector<16x16xf32> to vector<16xf32>
    %167 = vector.shape_cast %166 : vector<16xf32> to vector<16x1xf32>
    %168 = tpu.reciprocal %167 {approx = true} : vector<16x1xf32> -> vector<16x1xf32>
    %169 = vector.broadcast %168 : vector<16x1xf32> to vector<16x16xf32>
    %170 = arith.mulf %165, %169 : vector<16x16xf32>
    %171 = arith.truncf %170 : vector<16x16xf32> to vector<16x16xbf16>
    %172 = vector.extract_strided_slice %146 {offsets = [0, 0], sizes = [16, 8], strides = [1, 1]} : vector<16x32xf32> to vector<16x8xf32>
    %173 = arith.truncf %172 : vector<16x8xf32> to vector<16x8xbf16>
    %cst_49 = arith.constant dense<0.000000e+00> : vector<16x8xf32>
    %174 = tpu.matmul %171, %173, %cst_49 {dimension_numbers = #tpu.dot_dimension_numbers<[1], [0], [0], [1], [0, 0, 1, 1], [], []>} : vector<16x16xbf16>, vector<16x8xbf16>, vector<16x8xf32> -> vector<16x8xf32>
    %175 = vector.extract_strided_slice %151 {offsets = [1, 0], sizes = [1, 16], strides = [1, 1]} : vector<8x16xf32> to vector<1x16xf32>
    %176 = vector.extract_strided_slice %150 {offsets = [0, 5], sizes = [16, 1], strides = [1, 1]} : vector<16x8xf32> to vector<16x1xf32>
    %177 = vector.broadcast %176 : vector<16x1xf32> to vector<16x16xf32>
    %178 = vector.broadcast %175 : vector<1x16xf32> to vector<16x16xf32>
    %179 = arith.addf %177, %178 : vector<16x16xf32>
    %cst_50 = arith.constant 2.000000e-01 : f32
    %180 = vector.broadcast %cst_50 : f32 to vector<16x16xf32>
    %181 = arith.mulf %180, %179 : vector<16x16xf32>
    %182 = arith.maximumf %179, %181 : vector<16x16xf32>
    %183 = arith.addf %182, %5 : vector<16x16xf32>
    %cst_51 = arith.constant dense<0xFF800000> : vector<16xf32>
    %184 = vector.multi_reduction <maximumf>, %183, %cst_51 [1] : vector<16x16xf32> to vector<16xf32>
    %185 = vector.shape_cast %184 : vector<16xf32> to vector<16x1xf32>
    %186 = vector.broadcast %185 : vector<16x1xf32> to vector<16x16xf32>
    %187 = arith.subf %183, %186 : vector<16x16xf32>
    %188 = math.exp %187 : vector<16x16xf32>
    %cst_52 = arith.constant dense<0.000000e+00> : vector<16xf32>
    %189 = vector.multi_reduction <add>, %188, %cst_52 [1] : vector<16x16xf32> to vector<16xf32>
    %190 = vector.shape_cast %189 : vector<16xf32> to vector<16x1xf32>
    %191 = tpu.reciprocal %190 {approx = true} : vector<16x1xf32> -> vector<16x1xf32>
    %192 = vector.broadcast %191 : vector<16x1xf32> to vector<16x16xf32>
    %193 = arith.mulf %188, %192 : vector<16x16xf32>
    %194 = arith.truncf %193 : vector<16x16xf32> to vector<16x16xbf16>
    %195 = vector.extract_strided_slice %146 {offsets = [0, 8], sizes = [16, 8], strides = [1, 1]} : vector<16x32xf32> to vector<16x8xf32>
    %196 = arith.truncf %195 : vector<16x8xf32> to vector<16x8xbf16>
    %cst_53 = arith.constant dense<0.000000e+00> : vector<16x8xf32>
    %197 = tpu.matmul %194, %196, %cst_53 {dimension_numbers = #tpu.dot_dimension_numbers<[1], [0], [0], [1], [0, 0, 1, 1], [], []>} : vector<16x16xbf16>, vector<16x8xbf16>, vector<16x8xf32> -> vector<16x8xf32>
    %198 = vector.extract_strided_slice %151 {offsets = [2, 0], sizes = [1, 16], strides = [1, 1]} : vector<8x16xf32> to vector<1x16xf32>
    %199 = vector.extract_strided_slice %150 {offsets = [0, 6], sizes = [16, 1], strides = [1, 1]} : vector<16x8xf32> to vector<16x1xf32>
    %200 = vector.broadcast %199 : vector<16x1xf32> to vector<16x16xf32>
    %201 = vector.broadcast %198 : vector<1x16xf32> to vector<16x16xf32>
    %202 = arith.addf %200, %201 : vector<16x16xf32>
    %cst_54 = arith.constant 2.000000e-01 : f32
    %203 = vector.broadcast %cst_54 : f32 to vector<16x16xf32>
    %204 = arith.mulf %203, %202 : vector<16x16xf32>
    %205 = arith.maximumf %202, %204 : vector<16x16xf32>
    %206 = arith.addf %205, %5 : vector<16x16xf32>
    %cst_55 = arith.constant dense<0xFF800000> : vector<16xf32>
    %207 = vector.multi_reduction <maximumf>, %206, %cst_55 [1] : vector<16x16xf32> to vector<16xf32>
    %208 = vector.shape_cast %207 : vector<16xf32> to vector<16x1xf32>
    %209 = vector.broadcast %208 : vector<16x1xf32> to vector<16x16xf32>
    %210 = arith.subf %206, %209 : vector<16x16xf32>
    %211 = math.exp %210 : vector<16x16xf32>
    %cst_56 = arith.constant dense<0.000000e+00> : vector<16xf32>
    %212 = vector.multi_reduction <add>, %211, %cst_56 [1] : vector<16x16xf32> to vector<16xf32>
    %213 = vector.shape_cast %212 : vector<16xf32> to vector<16x1xf32>
    %214 = tpu.reciprocal %213 {approx = true} : vector<16x1xf32> -> vector<16x1xf32>
    %215 = vector.broadcast %214 : vector<16x1xf32> to vector<16x16xf32>
    %216 = arith.mulf %211, %215 : vector<16x16xf32>
    %217 = arith.truncf %216 : vector<16x16xf32> to vector<16x16xbf16>
    %218 = vector.extract_strided_slice %146 {offsets = [0, 16], sizes = [16, 8], strides = [1, 1]} : vector<16x32xf32> to vector<16x8xf32>
    %219 = arith.truncf %218 : vector<16x8xf32> to vector<16x8xbf16>
    %cst_57 = arith.constant dense<0.000000e+00> : vector<16x8xf32>
    %220 = tpu.matmul %217, %219, %cst_57 {dimension_numbers = #tpu.dot_dimension_numbers<[1], [0], [0], [1], [0, 0, 1, 1], [], []>} : vector<16x16xbf16>, vector<16x8xbf16>, vector<16x8xf32> -> vector<16x8xf32>
    %221 = vector.extract_strided_slice %151 {offsets = [3, 0], sizes = [1, 16], strides = [1, 1]} : vector<8x16xf32> to vector<1x16xf32>
    %222 = vector.extract_strided_slice %150 {offsets = [0, 7], sizes = [16, 1], strides = [1, 1]} : vector<16x8xf32> to vector<16x1xf32>
    %223 = vector.broadcast %222 : vector<16x1xf32> to vector<16x16xf32>
    %224 = vector.broadcast %221 : vector<1x16xf32> to vector<16x16xf32>
    %225 = arith.addf %223, %224 : vector<16x16xf32>
    %cst_58 = arith.constant 2.000000e-01 : f32
    %226 = vector.broadcast %cst_58 : f32 to vector<16x16xf32>
    %227 = arith.mulf %226, %225 : vector<16x16xf32>
    %228 = arith.maximumf %225, %227 : vector<16x16xf32>
    %229 = arith.addf %228, %5 : vector<16x16xf32>
    %cst_59 = arith.constant dense<0xFF800000> : vector<16xf32>
    %230 = vector.multi_reduction <maximumf>, %229, %cst_59 [1] : vector<16x16xf32> to vector<16xf32>
    %231 = vector.shape_cast %230 : vector<16xf32> to vector<16x1xf32>
    %232 = vector.broadcast %231 : vector<16x1xf32> to vector<16x16xf32>
    %233 = arith.subf %229, %232 : vector<16x16xf32>
    %234 = math.exp %233 : vector<16x16xf32>
    %cst_60 = arith.constant dense<0.000000e+00> : vector<16xf32>
    %235 = vector.multi_reduction <add>, %234, %cst_60 [1] : vector<16x16xf32> to vector<16xf32>
    %236 = vector.shape_cast %235 : vector<16xf32> to vector<16x1xf32>
    %237 = tpu.reciprocal %236 {approx = true} : vector<16x1xf32> -> vector<16x1xf32>
    %238 = vector.broadcast %237 : vector<16x1xf32> to vector<16x16xf32>
    %239 = arith.mulf %234, %238 : vector<16x16xf32>
    %240 = arith.truncf %239 : vector<16x16xf32> to vector<16x16xbf16>
    %241 = vector.extract_strided_slice %146 {offsets = [0, 24], sizes = [16, 8], strides = [1, 1]} : vector<16x32xf32> to vector<16x8xf32>
    %242 = arith.truncf %241 : vector<16x8xf32> to vector<16x8xbf16>
    %cst_61 = arith.constant dense<0.000000e+00> : vector<16x8xf32>
    %243 = tpu.matmul %240, %242, %cst_61 {dimension_numbers = #tpu.dot_dimension_numbers<[1], [0], [0], [1], [0, 0, 1, 1], [], []>} : vector<16x16xbf16>, vector<16x8xbf16>, vector<16x8xf32> -> vector<16x8xf32>
    %244 = tpu.concatenate %174, %197, %220, %243 in 1 : vector<16x8xf32>, vector<16x8xf32>, vector<16x8xf32>, vector<16x8xf32> -> vector<16x32xf32>
    %c0_62 = arith.constant 0 : index
    %c0_63 = arith.constant 0 : index
    %245 = vector.load %arg8[%c0_62, %c0_63] : memref<3x32xf32, #tpu.memory_space<vmem>>, vector<1x32xf32>
    %c1_64 = arith.constant 1 : index
    %c0_65 = arith.constant 0 : index
    %246 = vector.load %arg8[%c1_64, %c0_65] : memref<3x32xf32, #tpu.memory_space<vmem>>, vector<1x32xf32>
    %c2_66 = arith.constant 2 : index
    %c0_67 = arith.constant 0 : index
    %247 = vector.load %arg8[%c2_66, %c0_67] : memref<3x32xf32, #tpu.memory_space<vmem>>, vector<1x32xf32>
    %248 = vector.broadcast %245 : vector<1x32xf32> to vector<16x32xf32>
    %249 = arith.addf %244, %248 : vector<16x32xf32>
    %250 = vector.broadcast %6 : vector<16x1xf32> to vector<16x32xf32>
    %251 = arith.mulf %249, %250 : vector<16x32xf32>
    %cst_68 = arith.constant dense<0.000000e+00> : vector<32xf32>
    %252 = vector.multi_reduction <add>, %251, %cst_68 [0] : vector<16x32xf32> to vector<32xf32>
    %253 = vector.shape_cast %252 : vector<32xf32> to vector<1x32xf32>
    %cst_69 = arith.constant 1.600000e+01 : f32
    %254 = vector.broadcast %cst_69 : f32 to vector<1x32xf32>
    %255 = arith.divf %253, %254 : vector<1x32xf32>
    %256 = arith.mulf %251, %251 : vector<16x32xf32>
    %cst_70 = arith.constant dense<0.000000e+00> : vector<32xf32>
    %257 = vector.multi_reduction <add>, %256, %cst_70 [0] : vector<16x32xf32> to vector<32xf32>
    %258 = vector.shape_cast %257 : vector<32xf32> to vector<1x32xf32>
    %cst_71 = arith.constant 1.600000e+01 : f32
    %259 = vector.broadcast %cst_71 : f32 to vector<1x32xf32>
    %260 = arith.divf %258, %259 : vector<1x32xf32>
    %261 = arith.mulf %255, %255 : vector<1x32xf32>
    %262 = arith.subf %260, %261 : vector<1x32xf32>
    %cst_72 = arith.constant 0.000000e+00 : f32
    %263 = vector.broadcast %cst_72 : f32 to vector<1x32xf32>
    %264 = arith.maximumf %262, %263 : vector<1x32xf32>
    %265 = vector.broadcast %255 : vector<1x32xf32> to vector<16x32xf32>
    %266 = arith.subf %251, %265 : vector<16x32xf32>
    %cst_73 = arith.constant 9.99999974E-6 : f32
    %267 = vector.broadcast %cst_73 : f32 to vector<1x32xf32>
    %268 = arith.addf %264, %267 : vector<1x32xf32>
    %269 = math.rsqrt %268 : vector<1x32xf32>
    %270 = vector.broadcast %269 : vector<1x32xf32> to vector<16x32xf32>
    %271 = arith.mulf %266, %270 : vector<16x32xf32>
    %272 = vector.broadcast %246 : vector<1x32xf32> to vector<16x32xf32>
    %273 = arith.mulf %271, %272 : vector<16x32xf32>
    %274 = vector.broadcast %247 : vector<1x32xf32> to vector<16x32xf32>
    %275 = arith.addf %273, %274 : vector<16x32xf32>
    %cst_74 = arith.constant 0.000000e+00 : f32
    %276 = vector.broadcast %cst_74 : f32 to vector<16x32xf32>
    %277 = arith.maximumf %275, %276 : vector<16x32xf32>
    %278 = arith.truncf %277 : vector<16x32xf32> to vector<16x32xbf16>
    %c0_75 = arith.constant 0 : index
    %c0_76 = arith.constant 0 : index
    %279 = vector.load %arg9[%c0_75, %c0_76] : memref<32x32xf32, #tpu.memory_space<vmem>>, vector<32x32xf32>
    %280 = arith.truncf %279 : vector<32x32xf32> to vector<32x32xbf16>
    %cst_77 = arith.constant dense<0.000000e+00> : vector<16x32xf32>
    %281 = tpu.matmul %278, %280, %cst_77 {dimension_numbers = #tpu.dot_dimension_numbers<[1], [0], [0], [1], [0, 0, 1, 1], [], []>} : vector<16x32xbf16>, vector<32x32xbf16>, vector<16x32xf32> -> vector<16x32xf32>
    %282 = arith.truncf %281 : vector<16x32xf32> to vector<16x32xbf16>
    %c0_78 = arith.constant 0 : index
    %c0_79 = arith.constant 0 : index
    %283 = vector.load %arg10[%c0_78, %c0_79] : memref<32x8xf32, #tpu.memory_space<vmem>>, vector<32x8xf32>
    %284 = arith.truncf %283 : vector<32x8xf32> to vector<32x8xbf16>
    %cst_80 = arith.constant dense<0.000000e+00> : vector<16x8xf32>
    %285 = tpu.matmul %282, %284, %cst_80 {dimension_numbers = #tpu.dot_dimension_numbers<[1], [0], [0], [1], [0, 0, 1, 1], [], []>} : vector<16x32xbf16>, vector<32x8xbf16>, vector<16x8xf32> -> vector<16x8xf32>
    %286 = tpu.transpose %285, [1, 0] : vector<16x8xf32> -> vector<8x16xf32>
    %287 = vector.extract_strided_slice %286 {offsets = [0, 0], sizes = [1, 16], strides = [1, 1]} : vector<8x16xf32> to vector<1x16xf32>
    %288 = vector.extract_strided_slice %285 {offsets = [0, 4], sizes = [16, 1], strides = [1, 1]} : vector<16x8xf32> to vector<16x1xf32>
    %289 = vector.broadcast %288 : vector<16x1xf32> to vector<16x16xf32>
    %290 = vector.broadcast %287 : vector<1x16xf32> to vector<16x16xf32>
    %291 = arith.addf %289, %290 : vector<16x16xf32>
    %cst_81 = arith.constant 2.000000e-01 : f32
    %292 = vector.broadcast %cst_81 : f32 to vector<16x16xf32>
    %293 = arith.mulf %292, %291 : vector<16x16xf32>
    %294 = arith.maximumf %291, %293 : vector<16x16xf32>
    %295 = arith.addf %294, %5 : vector<16x16xf32>
    %cst_82 = arith.constant dense<0xFF800000> : vector<16xf32>
    %296 = vector.multi_reduction <maximumf>, %295, %cst_82 [1] : vector<16x16xf32> to vector<16xf32>
    %297 = vector.shape_cast %296 : vector<16xf32> to vector<16x1xf32>
    %298 = vector.broadcast %297 : vector<16x1xf32> to vector<16x16xf32>
    %299 = arith.subf %295, %298 : vector<16x16xf32>
    %300 = math.exp %299 : vector<16x16xf32>
    %cst_83 = arith.constant dense<0.000000e+00> : vector<16xf32>
    %301 = vector.multi_reduction <add>, %300, %cst_83 [1] : vector<16x16xf32> to vector<16xf32>
    %302 = vector.shape_cast %301 : vector<16xf32> to vector<16x1xf32>
    %303 = tpu.reciprocal %302 {approx = true} : vector<16x1xf32> -> vector<16x1xf32>
    %304 = vector.broadcast %303 : vector<16x1xf32> to vector<16x16xf32>
    %305 = arith.mulf %300, %304 : vector<16x16xf32>
    %306 = arith.truncf %305 : vector<16x16xf32> to vector<16x16xbf16>
    %307 = vector.extract_strided_slice %281 {offsets = [0, 0], sizes = [16, 8], strides = [1, 1]} : vector<16x32xf32> to vector<16x8xf32>
    %308 = arith.truncf %307 : vector<16x8xf32> to vector<16x8xbf16>
    %cst_84 = arith.constant dense<0.000000e+00> : vector<16x8xf32>
    %309 = tpu.matmul %306, %308, %cst_84 {dimension_numbers = #tpu.dot_dimension_numbers<[1], [0], [0], [1], [0, 0, 1, 1], [], []>} : vector<16x16xbf16>, vector<16x8xbf16>, vector<16x8xf32> -> vector<16x8xf32>
    %310 = vector.extract_strided_slice %286 {offsets = [1, 0], sizes = [1, 16], strides = [1, 1]} : vector<8x16xf32> to vector<1x16xf32>
    %311 = vector.extract_strided_slice %285 {offsets = [0, 5], sizes = [16, 1], strides = [1, 1]} : vector<16x8xf32> to vector<16x1xf32>
    %312 = vector.broadcast %311 : vector<16x1xf32> to vector<16x16xf32>
    %313 = vector.broadcast %310 : vector<1x16xf32> to vector<16x16xf32>
    %314 = arith.addf %312, %313 : vector<16x16xf32>
    %cst_85 = arith.constant 2.000000e-01 : f32
    %315 = vector.broadcast %cst_85 : f32 to vector<16x16xf32>
    %316 = arith.mulf %315, %314 : vector<16x16xf32>
    %317 = arith.maximumf %314, %316 : vector<16x16xf32>
    %318 = arith.addf %317, %5 : vector<16x16xf32>
    %cst_86 = arith.constant dense<0xFF800000> : vector<16xf32>
    %319 = vector.multi_reduction <maximumf>, %318, %cst_86 [1] : vector<16x16xf32> to vector<16xf32>
    %320 = vector.shape_cast %319 : vector<16xf32> to vector<16x1xf32>
    %321 = vector.broadcast %320 : vector<16x1xf32> to vector<16x16xf32>
    %322 = arith.subf %318, %321 : vector<16x16xf32>
    %323 = math.exp %322 : vector<16x16xf32>
    %cst_87 = arith.constant dense<0.000000e+00> : vector<16xf32>
    %324 = vector.multi_reduction <add>, %323, %cst_87 [1] : vector<16x16xf32> to vector<16xf32>
    %325 = vector.shape_cast %324 : vector<16xf32> to vector<16x1xf32>
    %326 = tpu.reciprocal %325 {approx = true} : vector<16x1xf32> -> vector<16x1xf32>
    %327 = vector.broadcast %326 : vector<16x1xf32> to vector<16x16xf32>
    %328 = arith.mulf %323, %327 : vector<16x16xf32>
    %329 = arith.truncf %328 : vector<16x16xf32> to vector<16x16xbf16>
    %330 = vector.extract_strided_slice %281 {offsets = [0, 8], sizes = [16, 8], strides = [1, 1]} : vector<16x32xf32> to vector<16x8xf32>
    %331 = arith.truncf %330 : vector<16x8xf32> to vector<16x8xbf16>
    %cst_88 = arith.constant dense<0.000000e+00> : vector<16x8xf32>
    %332 = tpu.matmul %329, %331, %cst_88 {dimension_numbers = #tpu.dot_dimension_numbers<[1], [0], [0], [1], [0, 0, 1, 1], [], []>} : vector<16x16xbf16>, vector<16x8xbf16>, vector<16x8xf32> -> vector<16x8xf32>
    %333 = vector.extract_strided_slice %286 {offsets = [2, 0], sizes = [1, 16], strides = [1, 1]} : vector<8x16xf32> to vector<1x16xf32>
    %334 = vector.extract_strided_slice %285 {offsets = [0, 6], sizes = [16, 1], strides = [1, 1]} : vector<16x8xf32> to vector<16x1xf32>
    %335 = vector.broadcast %334 : vector<16x1xf32> to vector<16x16xf32>
    %336 = vector.broadcast %333 : vector<1x16xf32> to vector<16x16xf32>
    %337 = arith.addf %335, %336 : vector<16x16xf32>
    %cst_89 = arith.constant 2.000000e-01 : f32
    %338 = vector.broadcast %cst_89 : f32 to vector<16x16xf32>
    %339 = arith.mulf %338, %337 : vector<16x16xf32>
    %340 = arith.maximumf %337, %339 : vector<16x16xf32>
    %341 = arith.addf %340, %5 : vector<16x16xf32>
    %cst_90 = arith.constant dense<0xFF800000> : vector<16xf32>
    %342 = vector.multi_reduction <maximumf>, %341, %cst_90 [1] : vector<16x16xf32> to vector<16xf32>
    %343 = vector.shape_cast %342 : vector<16xf32> to vector<16x1xf32>
    %344 = vector.broadcast %343 : vector<16x1xf32> to vector<16x16xf32>
    %345 = arith.subf %341, %344 : vector<16x16xf32>
    %346 = math.exp %345 : vector<16x16xf32>
    %cst_91 = arith.constant dense<0.000000e+00> : vector<16xf32>
    %347 = vector.multi_reduction <add>, %346, %cst_91 [1] : vector<16x16xf32> to vector<16xf32>
    %348 = vector.shape_cast %347 : vector<16xf32> to vector<16x1xf32>
    %349 = tpu.reciprocal %348 {approx = true} : vector<16x1xf32> -> vector<16x1xf32>
    %350 = vector.broadcast %349 : vector<16x1xf32> to vector<16x16xf32>
    %351 = arith.mulf %346, %350 : vector<16x16xf32>
    %352 = arith.truncf %351 : vector<16x16xf32> to vector<16x16xbf16>
    %353 = vector.extract_strided_slice %281 {offsets = [0, 16], sizes = [16, 8], strides = [1, 1]} : vector<16x32xf32> to vector<16x8xf32>
    %354 = arith.truncf %353 : vector<16x8xf32> to vector<16x8xbf16>
    %cst_92 = arith.constant dense<0.000000e+00> : vector<16x8xf32>
    %355 = tpu.matmul %352, %354, %cst_92 {dimension_numbers = #tpu.dot_dimension_numbers<[1], [0], [0], [1], [0, 0, 1, 1], [], []>} : vector<16x16xbf16>, vector<16x8xbf16>, vector<16x8xf32> -> vector<16x8xf32>
    %356 = vector.extract_strided_slice %286 {offsets = [3, 0], sizes = [1, 16], strides = [1, 1]} : vector<8x16xf32> to vector<1x16xf32>
    %357 = vector.extract_strided_slice %285 {offsets = [0, 7], sizes = [16, 1], strides = [1, 1]} : vector<16x8xf32> to vector<16x1xf32>
    %358 = vector.broadcast %357 : vector<16x1xf32> to vector<16x16xf32>
    %359 = vector.broadcast %356 : vector<1x16xf32> to vector<16x16xf32>
    %360 = arith.addf %358, %359 : vector<16x16xf32>
    %cst_93 = arith.constant 2.000000e-01 : f32
    %361 = vector.broadcast %cst_93 : f32 to vector<16x16xf32>
    %362 = arith.mulf %361, %360 : vector<16x16xf32>
    %363 = arith.maximumf %360, %362 : vector<16x16xf32>
    %364 = arith.addf %363, %5 : vector<16x16xf32>
    %cst_94 = arith.constant dense<0xFF800000> : vector<16xf32>
    %365 = vector.multi_reduction <maximumf>, %364, %cst_94 [1] : vector<16x16xf32> to vector<16xf32>
    %366 = vector.shape_cast %365 : vector<16xf32> to vector<16x1xf32>
    %367 = vector.broadcast %366 : vector<16x1xf32> to vector<16x16xf32>
    %368 = arith.subf %364, %367 : vector<16x16xf32>
    %369 = math.exp %368 : vector<16x16xf32>
    %cst_95 = arith.constant dense<0.000000e+00> : vector<16xf32>
    %370 = vector.multi_reduction <add>, %369, %cst_95 [1] : vector<16x16xf32> to vector<16xf32>
    %371 = vector.shape_cast %370 : vector<16xf32> to vector<16x1xf32>
    %372 = tpu.reciprocal %371 {approx = true} : vector<16x1xf32> -> vector<16x1xf32>
    %373 = vector.broadcast %372 : vector<16x1xf32> to vector<16x16xf32>
    %374 = arith.mulf %369, %373 : vector<16x16xf32>
    %375 = arith.truncf %374 : vector<16x16xf32> to vector<16x16xbf16>
    %376 = vector.extract_strided_slice %281 {offsets = [0, 24], sizes = [16, 8], strides = [1, 1]} : vector<16x32xf32> to vector<16x8xf32>
    %377 = arith.truncf %376 : vector<16x8xf32> to vector<16x8xbf16>
    %cst_96 = arith.constant dense<0.000000e+00> : vector<16x8xf32>
    %378 = tpu.matmul %375, %377, %cst_96 {dimension_numbers = #tpu.dot_dimension_numbers<[1], [0], [0], [1], [0, 0, 1, 1], [], []>} : vector<16x16xbf16>, vector<16x8xbf16>, vector<16x8xf32> -> vector<16x8xf32>
    %379 = tpu.concatenate %309, %332, %355, %378 in 1 : vector<16x8xf32>, vector<16x8xf32>, vector<16x8xf32>, vector<16x8xf32> -> vector<16x32xf32>
    %c0_97 = arith.constant 0 : index
    %c0_98 = arith.constant 0 : index
    %380 = vector.load %arg11[%c0_97, %c0_98] : memref<3x32xf32, #tpu.memory_space<vmem>>, vector<1x32xf32>
    %c1_99 = arith.constant 1 : index
    %c0_100 = arith.constant 0 : index
    %381 = vector.load %arg11[%c1_99, %c0_100] : memref<3x32xf32, #tpu.memory_space<vmem>>, vector<1x32xf32>
    %c2_101 = arith.constant 2 : index
    %c0_102 = arith.constant 0 : index
    %382 = vector.load %arg11[%c2_101, %c0_102] : memref<3x32xf32, #tpu.memory_space<vmem>>, vector<1x32xf32>
    %383 = vector.broadcast %380 : vector<1x32xf32> to vector<16x32xf32>
    %384 = arith.addf %379, %383 : vector<16x32xf32>
    %385 = vector.broadcast %6 : vector<16x1xf32> to vector<16x32xf32>
    %386 = arith.mulf %384, %385 : vector<16x32xf32>
    %cst_103 = arith.constant dense<0.000000e+00> : vector<32xf32>
    %387 = vector.multi_reduction <add>, %386, %cst_103 [0] : vector<16x32xf32> to vector<32xf32>
    %388 = vector.shape_cast %387 : vector<32xf32> to vector<1x32xf32>
    %cst_104 = arith.constant 1.600000e+01 : f32
    %389 = vector.broadcast %cst_104 : f32 to vector<1x32xf32>
    %390 = arith.divf %388, %389 : vector<1x32xf32>
    %391 = arith.mulf %386, %386 : vector<16x32xf32>
    %cst_105 = arith.constant dense<0.000000e+00> : vector<32xf32>
    %392 = vector.multi_reduction <add>, %391, %cst_105 [0] : vector<16x32xf32> to vector<32xf32>
    %393 = vector.shape_cast %392 : vector<32xf32> to vector<1x32xf32>
    %cst_106 = arith.constant 1.600000e+01 : f32
    %394 = vector.broadcast %cst_106 : f32 to vector<1x32xf32>
    %395 = arith.divf %393, %394 : vector<1x32xf32>
    %396 = arith.mulf %390, %390 : vector<1x32xf32>
    %397 = arith.subf %395, %396 : vector<1x32xf32>
    %cst_107 = arith.constant 0.000000e+00 : f32
    %398 = vector.broadcast %cst_107 : f32 to vector<1x32xf32>
    %399 = arith.maximumf %397, %398 : vector<1x32xf32>
    %400 = vector.broadcast %390 : vector<1x32xf32> to vector<16x32xf32>
    %401 = arith.subf %386, %400 : vector<16x32xf32>
    %cst_108 = arith.constant 9.99999974E-6 : f32
    %402 = vector.broadcast %cst_108 : f32 to vector<1x32xf32>
    %403 = arith.addf %399, %402 : vector<1x32xf32>
    %404 = math.rsqrt %403 : vector<1x32xf32>
    %405 = vector.broadcast %404 : vector<1x32xf32> to vector<16x32xf32>
    %406 = arith.mulf %401, %405 : vector<16x32xf32>
    %407 = vector.broadcast %381 : vector<1x32xf32> to vector<16x32xf32>
    %408 = arith.mulf %406, %407 : vector<16x32xf32>
    %409 = vector.broadcast %382 : vector<1x32xf32> to vector<16x32xf32>
    %410 = arith.addf %408, %409 : vector<16x32xf32>
    %cst_109 = arith.constant 0.000000e+00 : f32
    %411 = vector.broadcast %cst_109 : f32 to vector<16x32xf32>
    %412 = arith.maximumf %410, %411 : vector<16x32xf32>
    %c0_110 = arith.constant 0 : index
    %c0_111 = arith.constant 0 : index
    %413 = vector.load %arg12[%c0_110, %c0_111] : memref<2x16xf32, #tpu.memory_space<vmem>>, vector<2x16xf32>
    %414 = arith.truncf %413 : vector<2x16xf32> to vector<2x16xbf16>
    %415 = arith.truncf %412 : vector<16x32xf32> to vector<16x32xbf16>
    %cst_112 = arith.constant dense<0.000000e+00> : vector<2x32xf32>
    %416 = tpu.matmul %414, %415, %cst_112 {dimension_numbers = #tpu.dot_dimension_numbers<[1], [0], [0], [1], [0, 0, 1, 1], [], []>} : vector<2x16xbf16>, vector<16x32xbf16>, vector<2x32xf32> -> vector<2x32xf32>
    %417 = arith.truncf %416 : vector<2x32xf32> to vector<2x32xbf16>
    %c0_113 = arith.constant 0 : index
    %c0_114 = arith.constant 0 : index
    %418 = vector.load %arg13[%c0_113, %c0_114] : memref<32x8xf32, #tpu.memory_space<vmem>>, vector<32x8xf32>
    %419 = arith.truncf %418 : vector<32x8xf32> to vector<32x8xbf16>
    %cst_115 = arith.constant dense<0.000000e+00> : vector<2x8xf32>
    %420 = tpu.matmul %417, %419, %cst_115 {dimension_numbers = #tpu.dot_dimension_numbers<[1], [0], [0], [1], [0, 0, 1, 1], [], []>} : vector<2x32xbf16>, vector<32x8xbf16>, vector<2x8xf32> -> vector<2x8xf32>
    %c0_116 = arith.constant 0 : index
    %c0_117 = arith.constant 0 : index
    %421 = vector.load %arg14[%c0_116, %c0_117] : memref<1x8xf32, #tpu.memory_space<vmem>>, vector<1x8xf32>
    %422 = vector.broadcast %421 : vector<1x8xf32> to vector<2x8xf32>
    %423 = arith.addf %420, %422 : vector<2x8xf32>
    %cst_118 = arith.constant 0.000000e+00 : f32
    %424 = vector.broadcast %cst_118 : f32 to vector<2x8xf32>
    %425 = arith.maximumf %423, %424 : vector<2x8xf32>
    %426 = arith.truncf %425 : vector<2x8xf32> to vector<2x8xbf16>
    %c0_119 = arith.constant 0 : index
    %c0_120 = arith.constant 0 : index
    %427 = vector.load %arg15[%c0_119, %c0_120] : memref<8x1xf32, #tpu.memory_space<vmem>>, vector<8x1xf32>
    %428 = arith.truncf %427 : vector<8x1xf32> to vector<8x1xbf16>
    %cst_121 = arith.constant dense<0.000000e+00> : vector<2x1xf32>
    %429 = tpu.matmul %426, %428, %cst_121 {dimension_numbers = #tpu.dot_dimension_numbers<[1], [0], [0], [1], [0, 0, 1, 1], [], []>} : vector<2x8xbf16>, vector<8x1xbf16>, vector<2x1xf32> -> vector<2x1xf32>
    %c0_122 = arith.constant 0 : index
    %c0_123 = arith.constant 0 : index
    %430 = vector.load %arg16[%c0_122, %c0_123] : memref<1x1xf32, #tpu.memory_space<vmem>>, vector<1x1xf32>
    %431 = vector.broadcast %430 : vector<1x1xf32> to vector<2x1xf32>
    %432 = arith.addf %429, %431 : vector<2x1xf32>
    %c0_124 = arith.constant 0 : index
    %c0_125 = arith.constant 0 : index
    %433 = vector.load %arg17[%c0_124, %c0_125] : memref<2x1xf32, #tpu.memory_space<vmem>>, vector<2x1xf32>
    tpu.vector_store %arg17[%c0_124, %c0_125], %432 {strides = array<i32>} : memref<2x1xf32, #tpu.memory_space<vmem>>, vector<2x1xf32>,
    return
  }
}

</mosaic_0001>

<bundles_post_ra>
// kernel: gnn_forward.1
= control target key start
LH: loop header
LB: loop body
LE: loop exit
PB: predicated region body
PF: predicated region fallthrough
CT: control target
= control target key end

     0   :  { %v2349_v0 = vmov 0.0   ;;  %vm76_vm0 = vcmask 1043456   ;;  %vm2350_vm1 = vmmov 0   ;;  %vm72_vm2 = vcmask 64512   ;;  %s2357_s28 = smov 104   ;;  %s2362_s20 = smov 24   ;;  %s2923_s3 = inlined_call_operand.vmem [shape: f32[8,32], index: 3, kind: input, shape index: {}]   ;;  %s2924_s0 = inlined_call_operand.vmem [shape: f32[16,8], index: 0, kind: input, shape index: {}]   ;;  %s2925_s4 = inlined_call_operand.vmem [shape: f32[32,8], index: 4, kind: input, shape index: {}]   ;;  %s2926_s1 = inlined_call_operand.vmem [shape: f32[16,16], index: 1, kind: input, shape index: {}]   ;;  %s2927_s2 = inlined_call_operand.vmem [shape: f32[16,1], index: 2, kind: input, shape index: {}]   ;;  %s2928_s6 = inlined_call_operand.vmem [shape: f32[32,32], index: 6, kind: input, shape index: {}]   ;;  %s2929_s7 = inlined_call_operand.vmem [shape: f32[32,8], index: 7, kind: input, shape index: {}]   ;;  %s2930_s5 = inlined_call_operand.vmem [shape: f32[3,32], index: 5, kind: input, shape index: {}]   ;;  %s2931_s9 = inlined_call_operand.vmem [shape: f32[32,32], index: 9, kind: input, shape index: {}]   ;;  %s2932_s10 = inlined_call_operand.vmem [shape: f32[32,8], index: 10, kind: input, shape index: {}]   ;;  %s2933_s8 = inlined_call_operand.vmem [shape: f32[3,32], index: 8, kind: input, shape index: {}]   ;;  %s2934_s13 = inlined_call_operand.vmem [shape: f32[32,8], index: 13, kind: input, shape index: {}]   ;;  %s2935_s11 = inlined_call_operand.vmem [shape: f32[3,32], index: 11, kind: input, shape index: {}]   ;;  %s2936_s15 = inlined_call_operand.vmem [shape: f32[8,1], index: 15, kind: input, shape index: {}]   ;;  %s2937_s12 = inlined_call_operand.vmem [shape: f32[2,16], index: 12, kind: input, shape index: {}]   ;;  %s2938_s16 = inlined_call_operand.<no memory space> [shape: f32[1,1], index: 16, kind: input, shape index: {}]   ;;  %s2939_s14 = inlined_call_operand.vmem [shape: f32[1,8], index: 14, kind: input, shape index: {}]   ;;  %s2940_s17 = inlined_call_operand.vmem [shape: f32[2,1], index: 17, kind: output, shape index: {}]  }
   0x1   :  { %2942 = sst [smem:[#allocation3_spill]] %s2923_s3  ;;  %2070 = vmatprep.subr.bf16.mxu0 %v2349_v0  ;;  %2072 = vmatprep.mubr.msk.bf16.mxu0 %vm2350_vm1, %v2349_v0  ;;  %v122_v5 = vld [vmem:[%s2925_s4] sm:$0xff]  ;;  %v123_v6 = vld [vmem:[%s2925_s4 + $0x8] sm:$0xff]  ;;  %v124_v10 = vld [vmem:[%s2925_s4 + $0x10] sm:$0xff]  ;;  %v2351_v13 = vmov 5   ;;  %v2352_v14 = vmov 4   ;;  %v215_v28 = vlaneseq }
   0x2   :  { %2943 = sst [smem:[#allocation4_spill]] %s2924_s0  ;;  %s2944_s26 = sld [smem:[#allocation3_spill]]  ;;  %2076 = vmatprep.subr.bf16.mxu1 %v2349_v0  ;;  %2080 = vmatprep.mubr.msk.bf16.mxu1 %vm2350_vm1, %v2349_v0  ;;  %v126_v7 = vpack.c.bf16 %v123_v6, %v122_v5  ;;  %v125_v11 = vld [vmem:[%s2925_s4 + $0x18] sm:$0xff]  ;;  %vm128_vm3 = vcmask 261120   ;;  %v2353_v24 = vmov 7   ;;  %v2354_v25 = vmov 6  }
   0x3   :  { %s2945_s29 = sld [smem:[#allocation4_spill]]  ;;  %v127_v12 = vpack.c.bf16 %v125_v11, %v124_v10  ;;  %2223 = vset.pattern.permute.xlu1 %v2351_v13  ;;  %2222 = vset.pattern.permute.xlu0 %v2352_v14  ;;  %v216_v31 = vshrl.u32 %v215_v28, 7  ;;  %v60_v37 = vld [vmem:[%s2926_s1 + $0x8] sm:$0xff]  ;;  %v59_v38 = vld [vmem:[%s2926_s1] sm:$0xff]  ;;  %v2355_v53 = vmov -1e+30  }
   0x4   :  { %2077 = vmatpush3.bf16.msra.mxu1 %v126_v7  ;;  %vm62_vm4 = vcmp.gt.f32.partialorder %v60_v37, 0.0  ;;  %vm61_vm5 = vcmp.gt.f32.partialorder %v59_v38, 0.0  ;;  %vm227_vm6 = vcmask 130048   ;;  %s2356_s1 = smov 120   ;;  %s2361_s0 = smov 16   ;;  %vm594_vm7 = vcmask 195584  }
   0x5   :  { %2078 = vmatprep.subr.bf16.mxu1 %v2349_v0  ;;  %v2502_v33 = vsub.s32 0, %v216_v31  ;;  %v2504_v34 = vsub.s32 1, %v216_v31  ;;  %v2506_v35 = vsub.s32 2, %v216_v31  ;;  %v2514_v40 = vsub.s32 3, %v216_v31 }
   0x6   :  { %v2520_v54 = vsel %vm62_vm4, 0.0, %v2355_v53  ;;  %v2522_v55 = vsel %vm61_vm5, 0.0, %v2355_v53  ;;  %vm1984_vm8 = vcmask 1024  }
   0x8   :  { %v70_v1 = vld [vmem:[%s2944_s26] sm:$0xff]  ;;  %2079 = vmatpush3.bf16.msra.mxu1 %v127_v12 }
   0x9   :  { %v67_v2 = vld [vmem:[%s2945_s29] sm:$0xff]  ;;  %v71_v3 = vpack.c.bf16 %v70_v1, %v70_v1  ;;  %v68_v4 = vld [vmem:[%s2945_s29 + $0x8] sm:$0xff]  ;;  %2090 = vmatprep.subr.bf16.mxu1 %v2349_v0  ;;  %s2358_s29 = smov 112  }
   0xa   :  { %v69_v9 = vpack.c.bf16 %v68_v4, %v67_v2 }
   0xb   :  { %v78_v8 = vsel %vm76_vm0, %v71_v3, 0 }
   0xc   :  { %2071 = vmatpush3.bf16.msra.mxu0 %v78_v8 }
   0xd   :  { %2084 = vmatprep.subr.bf16.mxu0 %v2349_v0 }
   0xf   :  { %2073 = vmatmul.mubr.msk.bf16.vlgmr.msra.gmra.mrb[0].mxu0 %vm72_vm2, %v69_v9 }
  0x10   :  { %2086 = vmatprep.mubr.msk.bf16.mxu0 %vm2350_vm1, %v2349_v0 }
  0xe2   :  { %v114_v15 = vpop.f32.mrb[0].mxu0 }
  0xe3   :  { %v2074_v16 = vpop.f32.mrb[1].mxu0 }
  0xe4   :  { %v117_v17 = vpop.f32.mrb[2].mxu0 }
  0xe5   :  { %v2489_v18 = vpack.c.bf16 %v117_v17, %v114_v15  ;;  %v2075_v19 = vpop.f32.mrb[3].mxu0 }
  0xe7   :  { %2081 = vmatmul.mubr.msk.bf16.vlgmr.msra.gmra.mrb[0].mxu1 %vm128_vm3, %v2489_v18  ;;  %2085 = vmatpush3.bf16.msra.mxu0 %v2489_v18 }
  0xe8   :  { %2096 = vmatprep.subr.bf16.mxu0 %v2349_v0  ;;  %2092 = vmatprep.mubr.msk.bf16.mxu1 %vm2350_vm1, %v2349_v0 }
 0x1ba   :  { %v166_v20 = vpop.f32.mrb[0].mxu1 }
 0x1bb   :  { %296 = vperm.xlu1 %2223, %v166_v20   ;;  %207 = vperm.xlu0 %2222, %v166_v20   ;;  %v2082_v21 = vpop.f32.mrb[1].mxu1 }
 0x1bc   :  { %v169_v22 = vpop.f32.mrb[2].mxu1 }
 0x1bd   :  { %v2083_v23 = vpop.f32.mrb[3].mxu1 }
 0x1bf   :  { %2225 = vset.pattern.permute.xlu1 %v2353_v24  ;;  %212 = vperm.xlu0 %2222, %v169_v22  }
 0x1c0   :  { %477 = vperm.xlu1 %2225, %v166_v20  }
 0x1c3   :  { %2224 = vset.pattern.permute.xlu0 %v2354_v25 }
 0x1c4   :  { %2226 = vset.pattern.permute.xlu1 %v2351_v13  ;;  %387 = vperm.xlu0 %2224, %v166_v20  }
 0x1c5   :  { %300 = vperm.xlu1 %2226, %v169_v22  }
 0x1c8   :  { %2228 = vset.pattern.permute.xlu0 %v2353_v24 }
 0x1c9   :  { %2227 = vset.pattern.permute.xlu1 %v2354_v25  ;;  %481 = vperm.xlu0 %2228, %v169_v22  }
 0x1ca   :  { %391 = vperm.xlu1 %2227, %v169_v22  }
 0x1f3   :  { %173 = vxpose.xlu1.b32.start [1/2] (short) (narrow) %v166_v20, 8 }
 0x1f7   :  { %174 = vxpose.xlu1.b32.end [2/2] (short) (narrow) %v169_v22, 8 }
 0x23a   :  { %v297_v26 = vpop.permute.xlu1 %296  ;;  %v208_v30 = vpop.permute.xlu0 %207 }
 0x23e   :  { %v213_v36 = vpop.permute.xlu0 %212 }
 0x23f   :  { %v478_v27 = vpop.permute.xlu1 %477 }
 0x243   :  { %v388_v48 = vpop.permute.xlu0 %387 }
 0x244   :  { %v301_v29 = vpop.permute.xlu1 %300 }
 0x248   :  { %v482_v11 = vpop.permute.xlu0 %481 }
 0x249   :  { %v392_v32 = vpop.permute.xlu1 %391 }
 0x273   :  { %v189_v39 = vpop.trf.xlu1 }
 0x274   :  { %v218_v41 = vrot.slane %v189_v39, %v2502_v33  ;;  %v306_v42 = vrot.slane %v189_v39, %v2504_v34  ;;  %v397_v43 = vrot.slane %v189_v39, %v2506_v35  ;;  %v487_v52 = vrot.slane %v189_v39, %v2514_v40 }
 0x276   :  { %v308_v44 = vadd.f32 %v306_v42, %v301_v29  ;;  %v219_v45 = vadd.f32 %v218_v41, %v208_v30  ;;  %v307_v46 = vadd.f32 %v306_v42, %v297_v26  ;;  %v220_v47 = vadd.f32 %v218_v41, %v213_v36 }
 0x277   :  { %v398_v56 = vadd.f32 %v397_v43, %v388_v48  ;;  %v488_v1 = vadd.f32 %v487_v52, %v478_v27  ;;  %v399_v6 = vadd.f32 %v397_v43, %v392_v32  ;;  %v489_v12 = vadd.f32 %v487_v52, %v482_v11 }
 0x278   :  { %v310_v49 = vmul.f32 0.2, %v308_v44  ;;  %v221_v50 = vmul.f32 0.2, %v219_v45  ;;  %v309_v51 = vmul.f32 0.2, %v307_v46 }
 0x279   :  { %v222_v60 = vmul.f32 0.2, %v220_v47  ;;  %v400_v63 = vmul.f32 0.2, %v398_v56  ;;  %v490_v10 = vmul.f32 0.2, %v488_v1 }
 0x27a   :  { %v312_v57 = vmax.f32 %v308_v44, %v310_v49  ;;  %v223_v58 = vmax.f32 %v219_v45, %v221_v50  ;;  %v311_v59 = vmax.f32 %v307_v46, %v309_v51  ;;  %v401_v19 = vmul.f32 0.2, %v399_v6 }
 0x27b   :  { %v224_v5 = vmax.f32 %v220_v47, %v222_v60  ;;  %v402_v9 = vmax.f32 %v398_v56, %v400_v63  ;;  %v492_v17 = vmax.f32 %v488_v1, %v490_v10  ;;  %v491_v23 = vmul.f32 0.2, %v489_v12 }
 0x27c   :  { %v2525_v61 = vadd.f32 %v312_v57, %v2520_v54  ;;  %v225_v62 = vadd.f32 %v223_v58, %v2522_v55  ;;  %v313_v4 = vadd.f32 %v311_v59, %v2522_v55  ;;  %v403_v22 = vmax.f32 %v399_v6, %v401_v19 }
 0x27d   :  { %v226_v8 = vadd.f32 %v224_v5, %v2520_v54  ;;  %v404_v16 = vadd.f32 %v402_v9, %v2522_v55  ;;  %v494_v21 = vadd.f32 %v492_v17, %v2522_v55  ;;  %v493_v28 = vmax.f32 %v489_v12, %v491_v23 }
 0x27e   :  { %v318_v2 = vsel %vm227_vm6, %v2525_v61, -inf  ;;  %v228_v3 = vsel %vm227_vm6, %v225_v62, -inf  ;;  %v315_v7 = vsel %vm227_vm6, %v313_v4, -inf  ;;  %v405_v27 = vadd.f32 %v403_v22, %v2520_v54 }
 0x27f   :  { %319 = vmax.xlane.f32.xlu1 %v318_v2  ;;  %229 = vmax.xlane.f32.xlu0 %v228_v3  ;;  %v231_v15 = vsel %vm227_vm6, %v226_v8, -inf  ;;  %v406_v20 = vsel %vm227_vm6, %v404_v16, -inf  ;;  %v496_v26 = vsel %vm227_vm6, %v494_v21, -inf  ;;  %v495_v30 = vadd.f32 %v493_v28, %v2520_v54 }
 0x280   :  { %v409_v29 = vsel %vm227_vm6, %v405_v27, -inf  ;;  %v2359_v19 = vmov 0  }
 0x281   :  { %v499_v31 = vsel %vm227_vm6, %v495_v30, -inf  ;;  %2229 = vset.pattern.permute.xlu1 %v2359_v19  ;;  %2230 = vset.pattern.permute.xlu0 %v2359_v19  ;;  %v668_v19 = vld [vmem:[%s2928_s6 + $0x18] sm:$0xff] }
 0x283   :  { %316 = vmax.xlane.f32.xlu0 %v315_v7 }
 0x287   :  { %232 = vmax.xlane.f32.xlu0 %v231_v15 }
 0x28b   :  { %407 = vmax.xlane.f32.xlu0 %v406_v20  ;;  %v65_v20 = vld [vmem:[%s2927_s2] sm:$0xff] }
 0x28f   :  { %497 = vmax.xlane.f32.xlu0 %v496_v26 }
 0x290   :  { %339 = vrot.lane.b32.xlu1 %v2489_v18, %s2356_s1 }
 0x293   :  { %410 = vmax.xlane.f32.xlu0 %v409_v29 }
 0x297   :  { %500 = vmax.xlane.f32.xlu0 %v499_v31 }
 0x30c   :  { %v320_v32 = vpop.xlane.xlu1 %319  ;;  %v230_v36 = vpop.xlane.xlu0 %229 }
 0x30d   :  { %v234_v37 = vsub.f32 %v225_v62, %v230_v36  ;;  %v322_v48 = vsub.f32 %v2525_v61, %v320_v32 }
 0x30f   :  { %v236_v38 = vmul.f32 1.442695, %v234_v37  ;;  %v325_v58 = vmul.f32 1.442695, %v322_v48 }
 0x310   :  { %v340_v39 = vpop.permute.xlu1 %339  ;;  %v317_v41 = vpop.xlane.xlu0 %316 }
 0x311   :  { %v321_v42 = vsub.f32 %v313_v4, %v317_v41  ;;  %2091 = vmatpush3.bf16.msra.mxu1 %v340_v39  ;;  %2247 = vpow2.f32 %v236_v38 }
 0x312   :  { %2102 = vmatprep.subr.bf16.mxu1 %v2349_v0 }
 0x313   :  { %v323_v43 = vmul.f32 1.442695, %v321_v42 }
 0x314   :  { %v233_v44 = vpop.xlane.xlu0 %232 }
 0x315   :  { %2249 = vpow2.f32 %v323_v43  ;;  %v235_v45 = vsub.f32 %v226_v8, %v233_v44 }
 0x317   :  { %v238_v49 = vmul.f32 1.442695, %v235_v45 }
 0x318   :  { %v408_v46 = vpop.xlane.xlu0 %407 }
 0x319   :  { %v412_v47 = vsub.f32 %v404_v16, %v408_v46 }
 0x31b   :  { %v414_v50 = vmul.f32 1.442695, %v412_v47  ;;  %v2547_v51 = vpop.eup %2247 }
 0x31c   :  { %v498_v52 = vpop.xlane.xlu0 %497  ;;  %v240_v56 = vsel %vm227_vm6, %v2547_v51, 0.0 }
 0x31d   :  { %2251 = vpow2.f32 %v414_v50  ;;  %v502_v53 = vsub.f32 %v494_v21, %v498_v52  ;;  %241 = vadd.xlane.f32.xlu0 %v240_v56  ;;  %v66_v21 = vld [vmem:[%s2927_s2 + $0x8] sm:$0xff]  ;;  %s2360_s2 = smov 8  }
 0x31e   :  { %2253 = vpow2.f32 %v238_v49 }
 0x31f   :  { %v2551_v57 = vpop.eup %2249  ;;  %v504_v59 = vmul.f32 1.442695, %v502_v53 }
 0x320   :  { %v411_v60 = vpop.xlane.xlu0 %410  ;;  %v327_v61 = vsel %vm227_vm6, %v2551_v57, 0.0 }
 0x321   :  { %2255 = vpow2.f32 %v504_v59  ;;  %v413_v62 = vsub.f32 %v405_v27, %v411_v60  ;;  %328 = vadd.xlane.f32.xlu0 %v327_v61 }
 0x322   :  { %2257 = vpow2.f32 %v325_v58 }
 0x323   :  { %v416_v63 = vmul.f32 1.442695, %v413_v62 }
 0x324   :  { %v501_v1 = vpop.xlane.xlu0 %500 }
 0x325   :  { %v503_v2 = vsub.f32 %v495_v30, %v501_v1  ;;  %2259 = vpow2.f32 %v416_v63 }
 0x327   :  { %v2555_v3 = vpop.eup %2251  ;;  %v506_v4 = vmul.f32 1.442695, %v503_v2 }
 0x328   :  { %v418_v5 = vsel %vm227_vm6, %v2555_v3, 0.0  ;;  %v2254_v6 = vpop.eup %2253 }
 0x329   :  { %419 = vadd.xlane.f32.xlu0 %v418_v5  ;;  %2261 = vpow2.f32 %v506_v4  ;;  %v243_v8 = vsel %vm227_vm6, %v2254_v6, 0.0 }
 0x32b   :  { %v2559_v7 = vpop.eup %2255 }
 0x32c   :  { %v508_v9 = vsel %vm227_vm6, %v2559_v7, 0.0  ;;  %v2258_v10 = vpop.eup %2257 }
 0x32d   :  { %244 = vadd.xlane.f32.xlu0 %v243_v8  ;;  %509 = vadd.xlane.f32.xlu1 %v508_v9  ;;  %v330_v11 = vsel %vm227_vm6, %v2258_v10, 0.0 }
 0x32f   :  { %v2260_v12 = vpop.eup %2259 }
 0x330   :  { %v421_v15 = vsel %vm227_vm6, %v2260_v12, 0.0 }
 0x331   :  { %331 = vadd.xlane.f32.xlu0 %v330_v11 }
 0x333   :  { %v2262_v16 = vpop.eup %2261 }
 0x334   :  { %v511_v17 = vsel %vm227_vm6, %v2262_v16, 0.0 }
 0x335   :  { %422 = vadd.xlane.f32.xlu0 %v421_v15  ;;  %v666_v15 = vld [vmem:[%s2928_s6 + $0x8] sm:$0xff] }
 0x339   :  { %512 = vadd.xlane.f32.xlu0 %v511_v17 }
 0x33e   :  { %519 = vrot.lane.b32.xlu1 %v2489_v18, %s2357_s28 }
 0x342   :  { %608 = vperm.xlu1 %2229, %v65_v20  }
 0x346   :  { %2232 = vset.pattern.permute.xlu1 %v2351_v13 }
 0x34f   :  { %429 = vrot.lane.b32.xlu0 %v2489_v18, %s2358_s29 }
 0x353   :  { %613 = vperm.xlu0 %2230, %v66_v21   ;;  %v716_v21 = vld [vmem:[%s2929_s7] sm:$0xff] }
 0x357   :  { %2231 = vset.pattern.permute.xlu0 %v2352_v14 }
 0x3aa   :  { %v242_v22 = vpop.xlane.xlu0 %241 }
 0x3ab   :  { %2263 = vrcp.f32 %v242_v22  ;;  %v717_v22 = vld [vmem:[%s2929_s7 + $0x8] sm:$0xff] }
 0x3ae   :  { %v329_v23 = vpop.xlane.xlu0 %328 }
 0x3b5   :  { %v2264_v30 = vpop.eup %2263 }
 0x3b6   :  { %v420_v18 = vpop.xlane.xlu0 %419  ;;  %v248_v37 = vmul.f32 %v2264_v30, %v2547_v51 }
 0x3ba   :  { %v245_v26 = vpop.xlane.xlu0 %244  ;;  %v510_v28 = vpop.xlane.xlu1 %509 }
 0x3bb   :  { %2265 = vrcp.f32 %v245_v26 }
 0x3bc   :  { %2267 = vrcp.f32 %v329_v23  ;;  %v720_v23 = vpack.c.bf16 %v717_v22, %v716_v21  ;;  %v1998_v22 = vld [vmem:[%s2930_s5 + $0x2] ss:$0 sm:$0xff] }
 0x3be   :  { %v332_v27 = vpop.xlane.xlu0 %331  ;;  %v520_v49 = vpop.permute.xlu1 %519 }
 0x3bf   :  { %2269 = vrcp.f32 %v332_v27 }
 0x3c0   :  { %2271 = vrcp.f32 %v420_v18 }
 0x3c2   :  { %v423_v29 = vpop.xlane.xlu0 %422  ;;  %v2624_v18 = vpop.permute.xlu1 %608 }
 0x3c3   :  { %2273 = vrcp.f32 %v423_v29 }
 0x3c4   :  { %2275 = vrcp.f32 %v510_v28 }
 0x3c5   :  { %v2266_v31 = vpop.eup %2265 }
 0x3c6   :  { %v513_v32 = vpop.xlane.xlu0 %512  ;;  %v2268_v36 = vpop.eup %2267  ;;  %v249_v38 = vmul.f32 %v2266_v31, %v2254_v6  ;;  %v1996_v31 = vld [vmem:[%s2930_s5] ss:$0 sm:$0xff] }
 0x3c7   :  { %2277 = vrcp.f32 %v513_v32  ;;  %v335_v42 = vmul.f32 %v2268_v36, %v2551_v57 }
 0x3c8   :  { %v250_v41 = vpack.c.bf16 %v249_v38, %v248_v37 }
 0x3c9   :  { %v2270_v39 = vpop.eup %2269 }
 0x3ca   :  { %v336_v43 = vmul.f32 %v2270_v39, %v2258_v10  ;;  %v430_v44 = vpop.permute.xlu0 %429  ;;  %v2272_v45 = vpop.eup %2271  ;;  %2087 = vmatmul.mubr.msk.bf16.vlgmr.msra.gmra.mrb[4].mxu0 %vm227_vm6, %v250_v41 }
 0x3cb   :  { %2097 = vmatpush3.bf16.msra.mxu0 %v430_v44  ;;  %2098 = vmatprep.mubr.msk.bf16.mxu0 %vm2350_vm1, %v2349_v0  ;;  %v426_v48 = vmul.f32 %v2272_v45, %v2555_v3 }
 0x3cc   :  { %v337_v46 = vpack.c.bf16 %v336_v43, %v335_v42  ;;  %2108 = vmatprep.subr.bf16.mxu0 %v2349_v0 }
 0x3cd   :  { %v2274_v47 = vpop.eup %2273 }
 0x3ce   :  { %v427_v50 = vmul.f32 %v2274_v47, %v2260_v12  ;;  %2093 = vmatmul.mubr.msk.bf16.vlgmr.msra.gmra.mrb[4].mxu1 %vm227_vm6, %v337_v46  ;;  %v2276_v51 = vpop.eup %2275  ;;  %v665_v12 = vld [vmem:[%s2928_s6] sm:$0xff] }
 0x3cf   :  { %2103 = vmatpush3.bf16.msra.mxu1 %v520_v49  ;;  %2104 = vmatprep.mubr.msk.bf16.mxu1 %vm2350_vm1, %v2349_v0  ;;  %v516_v56 = vmul.f32 %v2276_v51, %v2559_v7  ;;  %v669_v17 = vpack.c.bf16 %v666_v15, %v665_v12 }
 0x3d0   :  { %v428_v52 = vpack.c.bf16 %v427_v50, %v426_v48  ;;  %2116 = vmatprep.subr.bf16.mxu1 %v2349_v0 }
 0x3d1   :  { %v2278_v53 = vpop.eup %2277 }
 0x3d2   :  { %v517_v57 = vmul.f32 %v2278_v53, %v2262_v16  ;;  %2099 = vmatmul.mubr.msk.bf16.vlgmr.msra.gmra.mrb[8].mxu0 %vm227_vm6, %v428_v52  ;;  %v667_v16 = vld [vmem:[%s2928_s6 + $0x10] sm:$0xff]  ;;  %v2626_v26 = vpop.permute.xlu0 %613 }
 0x3d3   :  { %2112 = vmatprep.mubr.msk.bf16.mxu0 %vm2350_vm1, %v2349_v0  ;;  %2109 = vmatpush3.bf16.msra.mxu0 %v669_v17  ;;  %v670_v20 = vpack.c.bf16 %v668_v19, %v667_v16  ;;  %v1997_v19 = vld [vmem:[%s2930_s5 + $0x1] ss:$0 sm:$0xff] }
 0x3d4   :  { %v518_v58 = vpack.c.bf16 %v517_v57, %v516_v56  ;;  %2110 = vmatprep.subr.bf16.mxu0 %v2349_v0 }
 0x3d6   :  { %2105 = vmatmul.mubr.msk.bf16.vlgmr.msra.gmra.mrb[8].mxu1 %vm227_vm6, %v518_v58 }
 0x3d7   :  { %2120 = vmatprep.mubr.msk.bf16.mxu1 %vm2350_vm1, %v2349_v0  ;;  %2111 = vmatpush3.bf16.msra.mxu0 %v670_v20 }
 0x3d8   :  { %2124 = vmatprep.subr.bf16.mxu0 %v2349_v0  ;;  %2117 = vmatpush3.bf16.msra.mxu1 %v720_v23 }
 0x3d9   :  { %2118 = vmatprep.subr.bf16.mxu1 %v2349_v0 }
 0x49d   :  { %v288_v59 = vpop.f32.mrb[4].mxu0 }
 0x49e   :  { %v2088_v60 = vpop.f32.mrb[5].mxu0 }
 0x49f   :  { %v291_v61 = vpop.f32.mrb[6].mxu0 }
 0x4a0   :  { %v2089_v62 = vpop.f32.mrb[7].mxu0 }
 0x4a1   :  { %v379_v63 = vpop.f32.mrb[4].mxu1 }
 0x4a2   :  { %568 = vrot.lane.b32.xlu1 %v379_v63, %s2360_s2  ;;  %v2094_v1 = vpop.f32.mrb[5].mxu1 }
 0x4a3   :  { %v382_v2 = vpop.f32.mrb[6].mxu1 }
 0x4a4   :  { %v2095_v3 = vpop.f32.mrb[7].mxu1 }
 0x4a5   :  { %v469_v4 = vpop.f32.mrb[8].mxu0 }
 0x4a6   :  { %570 = vrot.lane.b32.xlu1 %v382_v2, %s2360_s2  ;;  %576 = vrot.lane.b32.xlu0 %v469_v4, %s2361_s0  ;;  %v2100_v5 = vpop.f32.mrb[9].mxu0 }
 0x4a7   :  { %v472_v6 = vpop.f32.mrb[10].mxu0 }
 0x4a8   :  { %v2101_v7 = vpop.f32.mrb[11].mxu0 }
 0x4a9   :  { %v559_v8 = vpop.f32.mrb[8].mxu1 }
 0x4aa   :  { %v2106_v9 = vpop.f32.mrb[9].mxu1  ;;  %578 = vrot.lane.b32.xlu1 %v472_v6, %s2361_s0  ;;  %584 = vrot.lane.b32.xlu0 %v559_v8, %s2362_s20 }
 0x4ab   :  { %v562_v10 = vpop.f32.mrb[10].mxu1 }
 0x4ac   :  { %v2107_v11 = vpop.f32.mrb[11].mxu1 }
 0x4ae   :  { %586 = vrot.lane.b32.xlu1 %v562_v10, %s2362_s20 }
 0x514   :  { %v569_v27 = vpop.permute.xlu1 %568 }
 0x515   :  { %v590_v30 = vsel %vm72_vm2, %v288_v59, %v569_v27 }
 0x518   :  { %v571_v28 = vpop.permute.xlu1 %570  ;;  %v577_v29 = vpop.permute.xlu0 %576 }
 0x519   :  { %v592_v36 = vsel %vm227_vm6, %v590_v30, %v577_v29  ;;  %v591_v39 = vsel %vm72_vm2, %v291_v61, %v571_v28 }
 0x51c   :  { %v579_v32 = vpop.permute.xlu1 %578  ;;  %v585_v37 = vpop.permute.xlu0 %584 }
 0x51d   :  { %v595_v38 = vsel %vm594_vm7, %v592_v36, %v585_v37  ;;  %v593_v42 = vsel %vm227_vm6, %v591_v39, %v579_v32  ;;  %v718_v36 = vld [vmem:[%s2929_s7 + $0x10] sm:$0xff]  ;;  %v719_v37 = vld [vmem:[%s2929_s7 + $0x18] sm:$0xff] }
 0x51e   :  { %v604_v41 = vadd.f32 %v1996_v31, %v595_v38  ;;  %v721_v38 = vpack.c.bf16 %v719_v37, %v718_v36 }
 0x520   :  { %v587_v43 = vpop.permute.xlu1 %586  ;;  %v616_v44 = vmul.f32 %v2624_v18, %v604_v41  ;;  %2119 = vmatpush3.bf16.msra.mxu1 %v721_v38 }
 0x521   :  { %v596_v45 = vsel %vm594_vm7, %v593_v42, %v587_v43  ;;  %2130 = vmatprep.subr.bf16.mxu1 %v2349_v0 }
 0x522   :  { %v605_v46 = vadd.f32 %v1996_v31, %v596_v45  ;;  %v629_v47 = vmul.f32 %v616_v44, %v616_v44  ;;  %v618_v49 = vsel %vm128_vm3, %v616_v44, 0.0 }
 0x524   :  { %v617_v48 = vmul.f32 %v2626_v26, %v605_v46  ;;  %v631_v53 = vsel %vm128_vm3, %v629_v47, 0.0 }
 0x526   :  { %v619_v50 = vsel %vm128_vm3, %v617_v48, 0.0  ;;  %v630_v51 = vmul.f32 %v617_v48, %v617_v48 }
 0x527   :  { %v620_v52 = vadd.f32 %v619_v50, %v618_v49 }
 0x528   :  { %v632_v56 = vsel %vm128_vm3, %v630_v51, 0.0 }
 0x529   :  { %v621_v57 = vrot.slane %v620_v52, 4  ;;  %v633_v58 = vadd.f32 %v632_v56, %v631_v53 }
 0x52b   :  { %v622_v59 = vadd.f32 %v621_v57, %v620_v52  ;;  %v634_v60 = vrot.slane %v633_v58, 4 }
 0x52d   :  { %v623_v61 = vrot.slane %v622_v59, 2  ;;  %v635_v62 = vadd.f32 %v634_v60, %v633_v58 }
 0x52f   :  { %v624_v63 = vadd.f32 %v623_v61, %v622_v59  ;;  %v636_v1 = vrot.slane %v635_v62, 2 }
 0x531   :  { %v625_v2 = vrot.slane %v624_v63, 1  ;;  %v637_v3 = vadd.f32 %v636_v1, %v635_v62 }
 0x533   :  { %v626_v4 = vadd.f32 %v625_v2, %v624_v63  ;;  %v638_v5 = vrot.slane %v637_v3, 1 }
 0x535   :  { %v628_v6 = vmul.f32 0.0625, %v626_v4  ;;  %v639_v7 = vadd.f32 %v638_v5, %v637_v3 }
 0x537   :  { %v640_v8 = vmul.f32 0.0625, %v639_v7  ;;  %v641_v9 = vmul.f32 %v628_v6, %v628_v6  ;;  %v644_v10 = vsub.f32 %v616_v44, %v628_v6  ;;  %v645_v11 = vsub.f32 %v617_v48, %v628_v6 }
 0x539   :  { %v642_v12 = vsub.f32 %v640_v8, %v641_v9 }
 0x53b   :  { %v643_v15 = vmax.f32 %v642_v12, 0.0 }
 0x53d   :  { %v646_v16 = vadd.f32 1e-05, %v643_v15 }
 0x53f   :  { %2279 = vrsqrt.f32 %v646_v16 }
 0x549   :  { %v2280_v17 = vpop.eup %2279 }
 0x54a   :  { %v649_v20 = vmul.f32 %v2280_v17, %v645_v11  ;;  %v648_v21 = vmul.f32 %v2280_v17, %v644_v10 }
 0x54c   :  { %v655_v23 = vmul.f32 %v1997_v19, %v649_v20  ;;  %v654_v27 = vmul.f32 %v1997_v19, %v648_v21 }
 0x54e   :  { %v660_v28 = vadd.f32 %v1998_v22, %v654_v27  ;;  %v661_v29 = vadd.f32 %v1998_v22, %v655_v23 }
 0x550   :  { %v662_v30 = vmax.f32 %v660_v28, 0.0  ;;  %v663_v31 = vmax.f32 %v661_v29, 0.0 }
 0x552   :  { %v664_v32 = vpack.c.bf16 %v663_v31, %v662_v30 }
 0x554   :  { %2113 = vmatmul.mubr.msk.bf16.vlgmr.msra.gmra.mrb[12].mxu0 %vm128_vm3, %v664_v32 }
 0x555   :  { %2126 = vmatprep.mubr.msk.bf16.mxu0 %vm2350_vm1, %v2349_v0 }
 0x627   :  { %v708_v39 = vpop.f32.mrb[12].mxu0 }
 0x628   :  { %v2114_v41 = vpop.f32.mrb[13].mxu0 }
 0x629   :  { %v711_v42 = vpop.f32.mrb[14].mxu0 }
 0x62a   :  { %v2659_v43 = vpack.c.bf16 %v711_v42, %v708_v39  ;;  %v2115_v44 = vpop.f32.mrb[15].mxu0 }
 0x62c   :  { %2121 = vmatmul.mubr.msk.bf16.vlgmr.msra.gmra.mrb[12].mxu1 %vm128_vm3, %v2659_v43  ;;  %2125 = vmatpush3.bf16.msra.mxu0 %v2659_v43 }
 0x62d   :  { %2136 = vmatprep.subr.bf16.mxu0 %v2349_v0  ;;  %2132 = vmatprep.mubr.msk.bf16.mxu1 %vm2350_vm1, %v2349_v0 }
 0x6ff   :  { %v759_v45 = vpop.f32.mrb[12].mxu1 }
 0x700   :  { %888 = vperm.xlu1 %2232, %v759_v45   ;;  %800 = vperm.xlu0 %2231, %v759_v45   ;;  %v2122_v46 = vpop.f32.mrb[13].mxu1 }
 0x701   :  { %v762_v47 = vpop.f32.mrb[14].mxu1 }
 0x702   :  { %v2123_v48 = vpop.f32.mrb[15].mxu1 }
 0x704   :  { %2233 = vset.pattern.permute.xlu1 %v2354_v25  ;;  %2235 = vset.pattern.permute.xlu0 %v2351_v13 }
 0x705   :  { %979 = vperm.xlu1 %2233, %v759_v45   ;;  %892 = vperm.xlu0 %2235, %v762_v47  }
 0x709   :  { %2234 = vset.pattern.permute.xlu1 %v2352_v14  ;;  %2236 = vset.pattern.permute.xlu0 %v2353_v24 }
 0x70a   :  { %1069 = vperm.xlu0 %2236, %v759_v45   ;;  %805 = vperm.xlu1 %2234, %v762_v47  }
 0x70e   :  { %2237 = vset.pattern.permute.xlu1 %v2354_v25  ;;  %2239 = vset.pattern.permute.xlu0 %v2352_v14 }
 0x70f   :  { %983 = vperm.xlu1 %2237, %v762_v47  }
 0x713   :  { %2238 = vset.pattern.permute.xlu1 %v2353_v24 }
 0x714   :  { %1073 = vperm.xlu1 %2238, %v762_v47  }
 0x73d   :  { %766 = vxpose.xlu1.b32.start [1/2] (short) (narrow) %v759_v45, 8 }
 0x741   :  { %767 = vxpose.xlu1.b32.end [2/2] (short) (narrow) %v762_v47, 8 }
 0x75f   :  { %2240 = vset.pattern.permute.xlu1 %v2351_v13 }
 0x77f   :  { %v889_v49 = vpop.permute.xlu1 %888  ;;  %v801_v52 = vpop.permute.xlu0 %800 }
 0x784   :  { %v980_v50 = vpop.permute.xlu1 %979  ;;  %v893_v56 = vpop.permute.xlu0 %892 }
 0x789   :  { %v806_v51 = vpop.permute.xlu1 %805  ;;  %v1070_v63 = vpop.permute.xlu0 %1069 }
 0x78e   :  { %v984_v53 = vpop.permute.xlu1 %983 }
 0x793   :  { %v1074_v57 = vpop.permute.xlu1 %1073 }
 0x7bd   :  { %v782_v58 = vpop.trf.xlu1 }
 0x7be   :  { %v811_v59 = vrot.slane %v782_v58, %v2502_v33  ;;  %v898_v60 = vrot.slane %v782_v58, %v2504_v34  ;;  %v989_v61 = vrot.slane %v782_v58, %v2506_v35  ;;  %v1079_v62 = vrot.slane %v782_v58, %v2514_v40 }
 0x7c0   :  { %v990_v1 = vadd.f32 %v989_v61, %v980_v50  ;;  %v812_v2 = vadd.f32 %v811_v59, %v801_v52  ;;  %v899_v3 = vadd.f32 %v898_v60, %v889_v49  ;;  %v1080_v4 = vadd.f32 %v1079_v62, %v1070_v63 }
 0x7c1   :  { %v813_v8 = vadd.f32 %v811_v59, %v806_v51  ;;  %v900_v19 = vadd.f32 %v898_v60, %v893_v56  ;;  %v991_v27 = vadd.f32 %v989_v61, %v984_v53  ;;  %v1081_v32 = vadd.f32 %v1079_v62, %v1074_v57 }
 0x7c2   :  { %v992_v5 = vmul.f32 0.2, %v990_v1  ;;  %v814_v6 = vmul.f32 0.2, %v812_v2  ;;  %v901_v7 = vmul.f32 0.2, %v899_v3 }
 0x7c3   :  { %v1082_v12 = vmul.f32 0.2, %v1080_v4  ;;  %v815_v17 = vmul.f32 0.2, %v813_v8  ;;  %v902_v31 = vmul.f32 0.2, %v900_v19 }
 0x7c4   :  { %v994_v9 = vmax.f32 %v990_v1, %v992_v5  ;;  %v816_v10 = vmax.f32 %v812_v2, %v814_v6  ;;  %v903_v11 = vmax.f32 %v899_v3, %v901_v7  ;;  %v993_v39 = vmul.f32 0.2, %v991_v27 }
 0x7c5   :  { %v1084_v23 = vmax.f32 %v1080_v4, %v1082_v12  ;;  %v817_v30 = vmax.f32 %v813_v8, %v815_v17  ;;  %v904_v38 = vmax.f32 %v900_v19, %v902_v31  ;;  %v1083_v45 = vmul.f32 0.2, %v1081_v32 }
 0x7c6   :  { %v996_v15 = vadd.f32 %v994_v9, %v2522_v55  ;;  %v818_v16 = vadd.f32 %v816_v10, %v2522_v55  ;;  %v905_v22 = vadd.f32 %v903_v11, %v2522_v55  ;;  %v995_v44 = vmax.f32 %v991_v27, %v993_v39 }
 0x7c7   :  { %v1086_v29 = vadd.f32 %v1084_v23, %v2522_v55  ;;  %v819_v37 = vadd.f32 %v817_v30, %v2520_v54  ;;  %v906_v42 = vadd.f32 %v904_v38, %v2520_v54  ;;  %v1085_v48 = vmax.f32 %v1081_v32, %v1083_v45 }
 0x7c8   :  { %v998_v20 = vsel %vm227_vm6, %v996_v15, -inf  ;;  %v820_v21 = vsel %vm227_vm6, %v818_v16, -inf  ;;  %v907_v28 = vsel %vm227_vm6, %v905_v22, -inf  ;;  %v997_v47 = vadd.f32 %v995_v44, %v2520_v54 }
 0x7c9   :  { %999 = vmax.xlane.f32.xlu1 %v998_v20  ;;  %821 = vmax.xlane.f32.xlu0 %v820_v21  ;;  %v1088_v36 = vsel %vm227_vm6, %v1086_v29, -inf  ;;  %v823_v41 = vsel %vm227_vm6, %v819_v37, -inf  ;;  %v910_v46 = vsel %vm227_vm6, %v906_v42, -inf  ;;  %v1087_v50 = vadd.f32 %v1085_v48, %v2520_v54 }
 0x7ca   :  { %v1001_v49 = vsel %vm227_vm6, %v997_v47, -inf }
 0x7cb   :  { %v1091_v51 = vsel %vm227_vm6, %v1087_v50, -inf }
 0x7cd   :  { %908 = vmax.xlane.f32.xlu0 %v907_v28 }
 0x7d1   :  { %1089 = vmax.xlane.f32.xlu0 %v1088_v36 }
 0x7d5   :  { %824 = vmax.xlane.f32.xlu0 %v823_v41 }
 0x7d9   :  { %911 = vmax.xlane.f32.xlu0 %v910_v46 }
 0x7da   :  { %1021 = vrot.lane.b32.xlu1 %v2659_v43, %s2358_s29 }
 0x7dd   :  { %1002 = vmax.xlane.f32.xlu0 %v1001_v49 }
 0x7e1   :  { %1092 = vmax.xlane.f32.xlu0 %v1091_v51 }
 0x856   :  { %v822_v52 = vpop.xlane.xlu0 %821  ;;  %v1000_v53 = vpop.xlane.xlu1 %999 }
 0x857   :  { %v826_v56 = vsub.f32 %v818_v16, %v822_v52  ;;  %v1004_v58 = vsub.f32 %v996_v15, %v1000_v53 }
 0x859   :  { %v828_v57 = vmul.f32 1.442695, %v826_v56  ;;  %v1006_v62 = vmul.f32 1.442695, %v1004_v58 }
 0x85a   :  { %v909_v59 = vpop.xlane.xlu0 %908 }
 0x85b   :  { %v913_v60 = vsub.f32 %v905_v22, %v909_v59  ;;  %2281 = vpow2.f32 %v828_v57 }
 0x85d   :  { %v915_v61 = vmul.f32 1.442695, %v913_v60 }
 0x85e   :  { %v1090_v63 = vpop.xlane.xlu0 %1089 }
 0x85f   :  { %2283 = vpow2.f32 %v915_v61  ;;  %v1094_v1 = vsub.f32 %v1086_v29, %v1090_v63 }
 0x860   :  { %2285 = vpow2.f32 %v1006_v62 }
 0x861   :  { %v1096_v2 = vmul.f32 1.442695, %v1094_v1 }
 0x862   :  { %v825_v3 = vpop.xlane.xlu0 %824 }
 0x863   :  { %v827_v4 = vsub.f32 %v819_v37, %v825_v3  ;;  %2287 = vpow2.f32 %v1096_v2 }
 0x865   :  { %v2282_v5 = vpop.eup %2281  ;;  %v830_v6 = vmul.f32 1.442695, %v827_v4 }
 0x866   :  { %v912_v7 = vpop.xlane.xlu0 %911  ;;  %v832_v9 = vsel %vm227_vm6, %v2282_v5, 0.0 }
 0x867   :  { %v914_v8 = vsub.f32 %v906_v42, %v912_v7  ;;  %833 = vadd.xlane.f32.xlu0 %v832_v9  ;;  %2289 = vpow2.f32 %v830_v6 }
 0x869   :  { %v2284_v10 = vpop.eup %2283  ;;  %v917_v11 = vmul.f32 1.442695, %v914_v8 }
 0x86a   :  { %v1003_v12 = vpop.xlane.xlu0 %1002  ;;  %v919_v15 = vsel %vm227_vm6, %v2284_v10, 0.0  ;;  %v2699_v17 = vpop.eup %2285 }
 0x86b   :  { %v1005_v16 = vsub.f32 %v997_v47, %v1003_v12  ;;  %920 = vadd.xlane.f32.xlu0 %v919_v15  ;;  %2291 = vpow2.f32 %v917_v11  ;;  %v1010_v22 = vsel %vm227_vm6, %v2699_v17, 0.0  ;;  %v1022_v47 = vpop.permute.xlu1 %1021 }
 0x86d   :  { %v1008_v19 = vmul.f32 1.442695, %v1005_v16  ;;  %v2703_v23 = vpop.eup %2287 }
 0x86e   :  { %v1093_v20 = vpop.xlane.xlu0 %1092  ;;  %v1100_v28 = vsel %vm227_vm6, %v2703_v23, 0.0 }
 0x86f   :  { %v1095_v21 = vsub.f32 %v1087_v50, %v1093_v20  ;;  %1011 = vadd.xlane.f32.xlu0 %v1010_v22  ;;  %2293 = vpow2.f32 %v1008_v19 }
 0x871   :  { %v1098_v27 = vmul.f32 1.442695, %v1095_v21  ;;  %v2290_v29 = vpop.eup %2289 }
 0x872   :  { %v835_v30 = vsel %vm227_vm6, %v2290_v29, 0.0 }
 0x873   :  { %2295 = vpow2.f32 %v1098_v27  ;;  %1101 = vadd.xlane.f32.xlu0 %v1100_v28 }
 0x875   :  { %v2292_v31 = vpop.eup %2291 }
 0x876   :  { %v922_v32 = vsel %vm227_vm6, %v2292_v31, 0.0 }
 0x877   :  { %836 = vadd.xlane.f32.xlu0 %v835_v30 }
 0x879   :  { %v2294_v36 = vpop.eup %2293 }
 0x87a   :  { %v1013_v39 = vsel %vm227_vm6, %v2294_v36, 0.0 }
 0x87b   :  { %923 = vadd.xlane.f32.xlu0 %v922_v32 }
 0x87d   :  { %v2296_v37 = vpop.eup %2295 }
 0x87e   :  { %v1103_v38 = vsel %vm227_vm6, %v2296_v37, 0.0 }
 0x87f   :  { %1104 = vadd.xlane.f32.xlu1 %v1103_v38  ;;  %1014 = vadd.xlane.f32.xlu0 %v1013_v39  ;;  %v1247_v38 = vld [vmem:[%s2931_s9 + $0x10] sm:$0xff] }
 0x890   :  { %1111 = vrot.lane.b32.xlu1 %v2659_v43, %s2357_s28 }
 0x895   :  { %931 = vrot.lane.b32.xlu0 %v2659_v43, %s2356_s1 }
 0x8f4   :  { %v834_v41 = vpop.xlane.xlu0 %833 }
 0x8f5   :  { %2297 = vrcp.f32 %v834_v41  ;;  %v1248_v41 = vld [vmem:[%s2931_s9 + $0x18] sm:$0xff] }
 0x8f8   :  { %v921_v42 = vpop.xlane.xlu0 %920 }
 0x8fc   :  { %v1012_v44 = vpop.xlane.xlu0 %1011 }
 0x8ff   :  { %v2298_v51 = vpop.eup %2297 }
 0x900   :  { %v1102_v45 = vpop.xlane.xlu0 %1101  ;;  %v840_v43 = vmul.f32 %v2298_v51, %v2282_v5 }
 0x904   :  { %v837_v46 = vpop.xlane.xlu0 %836 }
 0x905   :  { %2299 = vrcp.f32 %v837_v46 }
 0x906   :  { %2301 = vrcp.f32 %v921_v42  ;;  %v1250_v42 = vpack.c.bf16 %v1248_v41, %v1247_v38  ;;  %v2006_v41 = vld [vmem:[%s2933_s8 + $0x1] ss:$0 sm:$0xff] }
 0x908   :  { %v924_v48 = vpop.xlane.xlu0 %923 }
 0x909   :  { %2303 = vrcp.f32 %v924_v48 }
 0x90a   :  { %2305 = vrcp.f32 %v1012_v44  ;;  %v1296_v44 = vld [vmem:[%s2932_s10] sm:$0xff] }
 0x90c   :  { %v1105_v49 = vpop.xlane.xlu1 %1104  ;;  %v1015_v50 = vpop.xlane.xlu0 %1014 }
 0x90d   :  { %2307 = vrcp.f32 %v1105_v49 }
 0x90e   :  { %2309 = vrcp.f32 %v1015_v50 }
 0x90f   :  { %v2300_v52 = vpop.eup %2299  ;;  %2311 = vrcp.f32 %v1102_v45  ;;  %v1297_v45 = vld [vmem:[%s2932_s10 + $0x8] sm:$0xff] }
 0x910   :  { %v841_v53 = vmul.f32 %v2300_v52, %v2290_v29  ;;  %v932_v56 = vpop.permute.xlu0 %931  ;;  %v2302_v57 = vpop.eup %2301  ;;  %v1300_v46 = vpack.c.bf16 %v1297_v45, %v1296_v44  ;;  %v2005_v52 = vld [vmem:[%s2933_s8] ss:$0 sm:$0xff]  ;;  %v2007_v45 = vld [vmem:[%s2933_s8 + $0x2] ss:$0 sm:$0xff] }
 0x911   :  { %2131 = vmatpush3.bf16.msra.mxu1 %v932_v56  ;;  %v927_v60 = vmul.f32 %v2302_v57, %v2284_v10  ;;  %v1112_v5 = vpop.permute.xlu1 %1111 }
 0x912   :  { %v842_v58 = vpack.c.bf16 %v841_v53, %v840_v43  ;;  %2142 = vmatprep.subr.bf16.mxu1 %v2349_v0 }
 0x913   :  { %v2304_v59 = vpop.eup %2303 }
 0x914   :  { %v928_v61 = vmul.f32 %v2304_v59, %v2292_v31  ;;  %2127 = vmatmul.mubr.msk.bf16.vlgmr.msra.gmra.mrb[16].mxu0 %vm227_vm6, %v842_v58  ;;  %v2306_v62 = vpop.eup %2305 }
 0x915   :  { %2137 = vmatpush3.bf16.msra.mxu0 %v1022_v47  ;;  %2138 = vmatprep.mubr.msk.bf16.mxu0 %vm2350_vm1, %v2349_v0  ;;  %v1018_v3 = vmul.f32 %v2306_v62, %v2699_v17 }
 0x916   :  { %v929_v1 = vpack.c.bf16 %v928_v61, %v927_v60  ;;  %2148 = vmatprep.subr.bf16.mxu0 %v2349_v0 }
 0x917   :  { %v2308_v63 = vpop.eup %2307 }
 0x918   :  { %v2310_v2 = vpop.eup %2309  ;;  %2133 = vmatmul.mubr.msk.bf16.vlgmr.msra.gmra.mrb[16].mxu1 %vm227_vm6, %v929_v1  ;;  %v1109_v7 = vmul.f32 %v2308_v63, %v2296_v37  ;;  %v1246_v37 = vld [vmem:[%s2931_s9 + $0x8] sm:$0xff] }
 0x919   :  { %v1019_v4 = vmul.f32 %v2310_v2, %v2294_v36  ;;  %v2312_v6 = vpop.eup %2311  ;;  %2143 = vmatpush3.bf16.msra.mxu1 %v1112_v5  ;;  %2144 = vmatprep.mubr.msk.bf16.mxu1 %vm2350_vm1, %v2349_v0  ;;  %v1245_v36 = vld [vmem:[%s2931_s9] sm:$0xff] }
 0x91a   :  { %2156 = vmatprep.subr.bf16.mxu1 %v2349_v0  ;;  %v1108_v9 = vmul.f32 %v2312_v6, %v2703_v23  ;;  %v1249_v39 = vpack.c.bf16 %v1246_v37, %v1245_v36 }
 0x91b   :  { %v1020_v8 = vpack.c.bf16 %v1019_v4, %v1018_v3 }
 0x91c   :  { %v1110_v10 = vpack.c.bf16 %v1109_v7, %v1108_v9 }
 0x91d   :  { %2139 = vmatmul.mubr.msk.bf16.vlgmr.msra.gmra.mrb[20].mxu0 %vm227_vm6, %v1020_v8 }
 0x91e   :  { %2152 = vmatprep.mubr.msk.bf16.mxu0 %vm2350_vm1, %v2349_v0  ;;  %2149 = vmatpush3.bf16.msra.mxu0 %v1249_v39 }
 0x91f   :  { %2150 = vmatprep.subr.bf16.mxu0 %v2349_v0 }
 0x920   :  { %2145 = vmatmul.mubr.msk.bf16.vlgmr.msra.gmra.mrb[20].mxu1 %vm227_vm6, %v1110_v10 }
 0x921   :  { %2160 = vmatprep.mubr.msk.bf16.mxu1 %vm2350_vm1, %v2349_v0  ;;  %2157 = vmatpush3.bf16.msra.mxu1 %v1300_v46 }
 0x922   :  { %2151 = vmatpush3.bf16.msra.mxu0 %v1250_v42  ;;  %2158 = vmatprep.subr.bf16.mxu1 %v2349_v0 }
 0x923   :  { %2164 = vmatprep.subr.bf16.mxu0 %v2349_v0 }
 0x9e7   :  { %v880_v11 = vpop.f32.mrb[16].mxu0 }
 0x9e8   :  { %v2128_v12 = vpop.f32.mrb[17].mxu0 }
 0x9e9   :  { %v883_v15 = vpop.f32.mrb[18].mxu0 }
 0x9ea   :  { %v2129_v16 = vpop.f32.mrb[19].mxu0 }
 0x9eb   :  { %v971_v17 = vpop.f32.mrb[16].mxu1 }
 0x9ec   :  { %1160 = vrot.lane.b32.xlu0 %v971_v17, %s2360_s2  ;;  %v2134_v19 = vpop.f32.mrb[17].mxu1 }
 0x9ed   :  { %v974_v20 = vpop.f32.mrb[18].mxu1 }
 0x9ee   :  { %1162 = vrot.lane.b32.xlu1 %v974_v20, %s2360_s2  ;;  %v2135_v21 = vpop.f32.mrb[19].mxu1 }
 0x9f0   :  { %v1061_v22 = vpop.f32.mrb[20].mxu0 }
 0x9f1   :  { %1168 = vrot.lane.b32.xlu0 %v1061_v22, %s2361_s0  ;;  %v2140_v23 = vpop.f32.mrb[21].mxu0 }
 0x9f2   :  { %v1064_v27 = vpop.f32.mrb[22].mxu0 }
 0x9f3   :  { %1170 = vrot.lane.b32.xlu1 %v1064_v27, %s2361_s0  ;;  %v2141_v28 = vpop.f32.mrb[23].mxu0  ;;  %v1151_v29 = vpop.f32.mrb[20].mxu1 }
 0x9f4   :  { %v2146_v30 = vpop.f32.mrb[21].mxu1 }
 0x9f5   :  { %1176 = vrot.lane.b32.xlu0 %v1151_v29, %s2362_s20  ;;  %v1154_v31 = vpop.f32.mrb[22].mxu1 }
 0x9f6   :  { %v2147_v32 = vpop.f32.mrb[23].mxu1 }
 0x9f7   :  { %1178 = vrot.lane.b32.xlu1 %v1154_v31, %s2362_s20 }
 0xa5e   :  { %v1161_v47 = vpop.permute.xlu0 %1160 }
 0xa5f   :  { %v1182_v51 = vsel %vm72_vm2, %v880_v11, %v1161_v47 }
 0xa60   :  { %v1163_v48 = vpop.permute.xlu1 %1162 }
 0xa61   :  { %v1183_v56 = vsel %vm72_vm2, %v883_v15, %v1163_v48 }
 0xa63   :  { %v1169_v49 = vpop.permute.xlu0 %1168 }
 0xa64   :  { %v1184_v43 = vsel %vm227_vm6, %v1182_v51, %v1169_v49 }
 0xa65   :  { %v1171_v50 = vpop.permute.xlu1 %1170 }
 0xa66   :  { %v1185_v58 = vsel %vm227_vm6, %v1183_v56, %v1171_v50 }
 0xa67   :  { %v1177_v53 = vpop.permute.xlu0 %1176 }
 0xa68   :  { %v1186_v57 = vsel %vm594_vm7, %v1184_v43, %v1177_v53  ;;  %v1298_v43 = vld [vmem:[%s2932_s10 + $0x10] sm:$0xff]  ;;  %v1299_v53 = vld [vmem:[%s2932_s10 + $0x18] sm:$0xff] }
 0xa69   :  { %v1195_v59 = vadd.f32 %v2005_v52, %v1186_v57  ;;  %v1179_v60 = vpop.permute.xlu1 %1178  ;;  %v1301_v56 = vpack.c.bf16 %v1299_v53, %v1298_v43 }
 0xa6a   :  { %v1187_v61 = vsel %vm594_vm7, %v1185_v58, %v1179_v60 }
 0xa6b   :  { %v1197_v62 = vmul.f32 %v1195_v59, %v2624_v18  ;;  %v1196_v63 = vadd.f32 %v2005_v52, %v1187_v61  ;;  %2159 = vmatpush3.bf16.msra.mxu1 %v1301_v56 }
 0xa6c   :  { %2170 = vmatprep.subr.bf16.mxu1 %v2349_v0 }
 0xa6d   :  { %v1209_v1 = vmul.f32 %v1197_v62, %v1197_v62  ;;  %v1198_v2 = vmul.f32 %v1196_v63, %v2626_v26  ;;  %v1199_v3 = vsel %vm128_vm3, %v1197_v62, 0.0 }
 0xa6f   :  { %v1200_v4 = vsel %vm128_vm3, %v1198_v2, 0.0  ;;  %v1210_v5 = vmul.f32 %v1198_v2, %v1198_v2  ;;  %v1211_v7 = vsel %vm128_vm3, %v1209_v1, 0.0 }
 0xa70   :  { %v1201_v6 = vadd.f32 %v1200_v4, %v1199_v3 }
 0xa71   :  { %v1212_v8 = vsel %vm128_vm3, %v1210_v5, 0.0 }
 0xa72   :  { %v1202_v9 = vrot.slane %v1201_v6, 4  ;;  %v1213_v10 = vadd.f32 %v1212_v8, %v1211_v7 }
 0xa74   :  { %v1203_v11 = vadd.f32 %v1202_v9, %v1201_v6  ;;  %v1214_v12 = vrot.slane %v1213_v10, 4 }
 0xa76   :  { %v1204_v15 = vrot.slane %v1203_v11, 2  ;;  %v1215_v16 = vadd.f32 %v1214_v12, %v1213_v10 }
 0xa78   :  { %v1205_v17 = vadd.f32 %v1204_v15, %v1203_v11  ;;  %v1216_v19 = vrot.slane %v1215_v16, 2 }
 0xa7a   :  { %v1206_v20 = vrot.slane %v1205_v17, 1  ;;  %v1217_v21 = vadd.f32 %v1216_v19, %v1215_v16 }
 0xa7c   :  { %v1207_v22 = vadd.f32 %v1206_v20, %v1205_v17  ;;  %v1218_v23 = vrot.slane %v1217_v21, 1 }
 0xa7e   :  { %v1208_v27 = vmul.f32 0.0625, %v1207_v22  ;;  %v1219_v28 = vadd.f32 %v1218_v23, %v1217_v21 }
 0xa80   :  { %v1220_v29 = vmul.f32 0.0625, %v1219_v28  ;;  %v1221_v30 = vmul.f32 %v1208_v27, %v1208_v27  ;;  %v1224_v31 = vsub.f32 %v1197_v62, %v1208_v27  ;;  %v1225_v32 = vsub.f32 %v1198_v2, %v1208_v27 }
 0xa82   :  { %v1222_v36 = vsub.f32 %v1220_v29, %v1221_v30 }
 0xa84   :  { %v1223_v37 = vmax.f32 %v1222_v36, 0.0 }
 0xa86   :  { %v1226_v38 = vadd.f32 1e-05, %v1223_v37 }
 0xa88   :  { %2313 = vrsqrt.f32 %v1226_v38 }
 0xa92   :  { %v2314_v39 = vpop.eup %2313 }
 0xa93   :  { %v1229_v42 = vmul.f32 %v2314_v39, %v1225_v32  ;;  %v1228_v44 = vmul.f32 %v2314_v39, %v1224_v31 }
 0xa95   :  { %v1235_v46 = vmul.f32 %v2006_v41, %v1229_v42  ;;  %v1234_v47 = vmul.f32 %v2006_v41, %v1228_v44 }
 0xa97   :  { %v1240_v48 = vadd.f32 %v2007_v45, %v1234_v47  ;;  %v1241_v49 = vadd.f32 %v2007_v45, %v1235_v46 }
 0xa99   :  { %v1242_v50 = vmax.f32 %v1240_v48, 0.0  ;;  %v1243_v51 = vmax.f32 %v1241_v49, 0.0 }
 0xa9b   :  { %v1244_v52 = vpack.c.bf16 %v1243_v51, %v1242_v50 }
 0xa9d   :  { %2153 = vmatmul.mubr.msk.bf16.vlgmr.msra.gmra.mrb[24].mxu0 %vm128_vm3, %v1244_v52 }
 0xa9e   :  { %2166 = vmatprep.mubr.msk.bf16.mxu0 %vm2350_vm1, %v2349_v0 }
 0xb70   :  { %v1288_v57 = vpop.f32.mrb[24].mxu0 }
 0xb71   :  { %v2154_v58 = vpop.f32.mrb[25].mxu0 }
 0xb72   :  { %v1291_v59 = vpop.f32.mrb[26].mxu0 }
 0xb73   :  { %v2790_v60 = vpack.c.bf16 %v1291_v59, %v1288_v57  ;;  %v2155_v61 = vpop.f32.mrb[27].mxu0 }
 0xb75   :  { %2161 = vmatmul.mubr.msk.bf16.vlgmr.msra.gmra.mrb[24].mxu1 %vm128_vm3, %v2790_v60  ;;  %2165 = vmatpush3.bf16.msra.mxu0 %v2790_v60 }
 0xb76   :  { %2176 = vmatprep.subr.bf16.mxu0 %v2349_v0  ;;  %2172 = vmatprep.mubr.msk.bf16.mxu1 %vm2350_vm1, %v2349_v0 }
 0xc48   :  { %v1339_v62 = vpop.f32.mrb[24].mxu1 }
 0xc49   :  { %1468 = vperm.xlu1 %2240, %v1339_v62   ;;  %1380 = vperm.xlu0 %2239, %v1339_v62   ;;  %v2162_v63 = vpop.f32.mrb[25].mxu1 }
 0xc4a   :  { %v1342_v1 = vpop.f32.mrb[26].mxu1 }
 0xc4b   :  { %v2163_v2 = vpop.f32.mrb[27].mxu1 }
 0xc4d   :  { %2241 = vset.pattern.permute.xlu1 %v2354_v25  ;;  %2243 = vset.pattern.permute.xlu0 %v2351_v13 }
 0xc4e   :  { %1559 = vperm.xlu1 %2241, %v1339_v62   ;;  %1472 = vperm.xlu0 %2243, %v1342_v1  }
 0xc52   :  { %2242 = vset.pattern.permute.xlu1 %v2352_v14  ;;  %2244 = vset.pattern.permute.xlu0 %v2353_v24 }
 0xc53   :  { %1649 = vperm.xlu0 %2244, %v1339_v62   ;;  %1385 = vperm.xlu1 %2242, %v1342_v1  }
 0xc57   :  { %2245 = vset.pattern.permute.xlu1 %v2354_v25 }
 0xc58   :  { %1563 = vperm.xlu1 %2245, %v1342_v1  }
 0xc5c   :  { %2246 = vset.pattern.permute.xlu1 %v2353_v24 }
 0xc5d   :  { %1653 = vperm.xlu1 %2246, %v1342_v1  }
 0xc86   :  { %1346 = vxpose.xlu1.b32.start [1/2] (short) (narrow) %v1339_v62, 8 }
 0xc8a   :  { %1347 = vxpose.xlu1.b32.end [2/2] (short) (narrow) %v1342_v1, 8 }
 0xcc8   :  { %v1469_v3 = vpop.permute.xlu1 %1468  ;;  %v1381_v13 = vpop.permute.xlu0 %1380 }
 0xccd   :  { %v1560_v4 = vpop.permute.xlu1 %1559  ;;  %v1473_v7 = vpop.permute.xlu0 %1472 }
 0xcd2   :  { %v1386_v5 = vpop.permute.xlu1 %1385  ;;  %v1650_v24 = vpop.permute.xlu0 %1649 }
 0xcd7   :  { %v1564_v6 = vpop.permute.xlu1 %1563 }
 0xcdc   :  { %v1654_v8 = vpop.permute.xlu1 %1653 }
 0xd06   :  { %v1362_v14 = vpop.trf.xlu1 }
 0xd07   :  { %v1391_v9 = vrot.slane %v1362_v14, %v2502_v33  ;;  %v1478_v10 = vrot.slane %v1362_v14, %v2504_v34  ;;  %v1569_v25 = vrot.slane %v1362_v14, %v2506_v35  ;;  %v1659_v11 = vrot.slane %v1362_v14, %v2514_v40 }
 0xd09   :  { %v1570_v12 = vadd.f32 %v1569_v25, %v1560_v4  ;;  %v1392_v15 = vadd.f32 %v1391_v9, %v1381_v13  ;;  %v1479_v16 = vadd.f32 %v1478_v10, %v1469_v3  ;;  %v1660_v17 = vadd.f32 %v1659_v11, %v1650_v24 }
 0xd0a   :  { %v1393_v22 = vadd.f32 %v1391_v9, %v1386_v5  ;;  %v1480_v30 = vadd.f32 %v1478_v10, %v1473_v7  ;;  %v1571_v37 = vadd.f32 %v1569_v25, %v1564_v6  ;;  %v1661_v44 = vadd.f32 %v1659_v11, %v1654_v8 }
 0xd0b   :  { %v1572_v19 = vmul.f32 0.2, %v1570_v12  ;;  %v1394_v20 = vmul.f32 0.2, %v1392_v15  ;;  %v1481_v21 = vmul.f32 0.2, %v1479_v16 }
 0xd0c   :  { %v1662_v29 = vmul.f32 0.2, %v1660_v17  ;;  %v1395_v35 = vmul.f32 0.2, %v1393_v22  ;;  %v1482_v42 = vmul.f32 0.2, %v1480_v30 }
 0xd0d   :  { %v1574_v23 = vmax.f32 %v1570_v12, %v1572_v19  ;;  %v1396_v27 = vmax.f32 %v1392_v15, %v1394_v20  ;;  %v1483_v28 = vmax.f32 %v1479_v16, %v1481_v21  ;;  %v1573_v48 = vmul.f32 0.2, %v1571_v37 }
 0xd0e   :  { %v1664_v36 = vmax.f32 %v1660_v17, %v1662_v29  ;;  %v1397_v41 = vmax.f32 %v1393_v22, %v1395_v35  ;;  %v1484_v47 = vmax.f32 %v1480_v30, %v1482_v42  ;;  %v1663_v52 = vmul.f32 0.2, %v1661_v44 }
 0xd0f   :  { %v1576_v33 = vadd.f32 %v1574_v23, %v2522_v55  ;;  %v1398_v34 = vadd.f32 %v1396_v27, %v2522_v55  ;;  %v1485_v32 = vadd.f32 %v1483_v28, %v2522_v55  ;;  %v1575_v51 = vmax.f32 %v1571_v37, %v1573_v48 }
 0xd10   :  { %v1666_v39 = vadd.f32 %v1664_v36, %v2522_v55  ;;  %v1399_v46 = vadd.f32 %v1397_v41, %v2520_v54  ;;  %v1486_v50 = vadd.f32 %v1484_v47, %v2520_v54  ;;  %v1665_v53 = vmax.f32 %v1661_v44, %v1663_v52 }
 0xd11   :  { %v1578_v40 = vsel %vm227_vm6, %v1576_v33, -inf  ;;  %v1400_v31 = vsel %vm227_vm6, %v1398_v34, -inf  ;;  %v1487_v38 = vsel %vm227_vm6, %v1485_v32, -inf  ;;  %v1577_v43 = vadd.f32 %v1575_v51, %v2520_v54 }
 0xd12   :  { %1579 = vmax.xlane.f32.xlu1 %v1578_v40  ;;  %1401 = vmax.xlane.f32.xlu0 %v1400_v31  ;;  %v1668_v45 = vsel %vm227_vm6, %v1666_v39, -inf  ;;  %v1403_v49 = vsel %vm227_vm6, %v1399_v46, -inf  ;;  %v1490_v55 = vsel %vm227_vm6, %v1486_v50, -inf  ;;  %v1667_v57 = vadd.f32 %v1665_v53, %v2520_v54 }
 0xd13   :  { %v1581_v56 = vsel %vm227_vm6, %v1577_v43, -inf }
 0xd14   :  { %v1671_v58 = vsel %vm227_vm6, %v1667_v57, -inf }
 0xd16   :  { %1488 = vmax.xlane.f32.xlu0 %v1487_v38 }
 0xd1a   :  { %1669 = vmax.xlane.f32.xlu0 %v1668_v45 }
 0xd1e   :  { %1404 = vmax.xlane.f32.xlu0 %v1403_v49 }
 0xd22   :  { %1491 = vmax.xlane.f32.xlu0 %v1490_v55 }
 0xd23   :  { %1601 = vrot.lane.b32.xlu1 %v2790_v60, %s2358_s29 }
 0xd26   :  { %1582 = vmax.xlane.f32.xlu0 %v1581_v56 }
 0xd2a   :  { %1672 = vmax.xlane.f32.xlu0 %v1671_v58 }
 0xd9f   :  { %v1402_v59 = vpop.xlane.xlu0 %1401  ;;  %v1580_v61 = vpop.xlane.xlu1 %1579 }
 0xda0   :  { %v1406_v62 = vsub.f32 %v1398_v34, %v1402_v59  ;;  %v1584_v1 = vsub.f32 %v1576_v33, %v1580_v61 }
 0xda2   :  { %v1408_v63 = vmul.f32 1.442695, %v1406_v62  ;;  %v1586_v5 = vmul.f32 1.442695, %v1584_v1 }
 0xda3   :  { %v1489_v2 = vpop.xlane.xlu0 %1488  ;;  %v1602_v44 = vpop.permute.xlu1 %1601 }
 0xda4   :  { %v1493_v3 = vsub.f32 %v1485_v32, %v1489_v2  ;;  %2315 = vpow2.f32 %v1408_v63 }
 0xda6   :  { %v1495_v4 = vmul.f32 1.442695, %v1493_v3 }
 0xda7   :  { %v1670_v13 = vpop.xlane.xlu0 %1669 }
 0xda8   :  { %2317 = vpow2.f32 %v1495_v4  ;;  %v1674_v6 = vsub.f32 %v1666_v39, %v1670_v13 }
 0xda9   :  { %2319 = vpow2.f32 %v1586_v5 }
 0xdaa   :  { %v1676_v7 = vmul.f32 1.442695, %v1674_v6 }
 0xdab   :  { %v1405_v54 = vpop.xlane.xlu0 %1404 }
 0xdac   :  { %v1407_v8 = vsub.f32 %v1399_v46, %v1405_v54  ;;  %2321 = vpow2.f32 %v1676_v7 }
 0xdae   :  { %v2316_v14 = vpop.eup %2315  ;;  %v1410_v9 = vmul.f32 1.442695, %v1407_v8 }
 0xdaf   :  { %v1492_v10 = vpop.xlane.xlu0 %1491  ;;  %v1412_v11 = vsel %vm227_vm6, %v2316_v14, 0.0 }
 0xdb0   :  { %v1494_v25 = vsub.f32 %v1486_v50, %v1492_v10  ;;  %1413 = vadd.xlane.f32.xlu0 %v1412_v11  ;;  %2323 = vpow2.f32 %v1410_v9 }
 0xdb2   :  { %v2318_v24 = vpop.eup %2317  ;;  %v1497_v12 = vmul.f32 1.442695, %v1494_v25 }
 0xdb3   :  { %v1583_v15 = vpop.xlane.xlu0 %1582  ;;  %v1499_v16 = vsel %vm227_vm6, %v2318_v24, 0.0  ;;  %v2828_v19 = vpop.eup %2319 }
 0xdb4   :  { %v1585_v17 = vsub.f32 %v1577_v43, %v1583_v15  ;;  %1500 = vadd.xlane.f32.xlu0 %v1499_v16  ;;  %2325 = vpow2.f32 %v1497_v12  ;;  %v1590_v23 = vsel %vm227_vm6, %v2828_v19, 0.0 }
 0xdb6   :  { %v1588_v20 = vmul.f32 1.442695, %v1585_v17  ;;  %v2832_v27 = vpop.eup %2321 }
 0xdb7   :  { %v1673_v21 = vpop.xlane.xlu0 %1672  ;;  %v1680_v29 = vsel %vm227_vm6, %v2832_v27, 0.0 }
 0xdb8   :  { %v1675_v22 = vsub.f32 %v1667_v57, %v1673_v21  ;;  %1591 = vadd.xlane.f32.xlu0 %v1590_v23  ;;  %2327 = vpow2.f32 %v1588_v20  ;;  %v1871_v21 = vld [vmem:[%s2934_s13] sm:$0xff] }
 0xdba   :  { %v1678_v28 = vmul.f32 1.442695, %v1675_v22  ;;  %v2324_v33 = vpop.eup %2323  ;;  %v1872_v22 = vld [vmem:[%s2934_s13 + $0x8] sm:$0xff] }
 0xdbb   :  { %v1415_v34 = vsel %vm227_vm6, %v2324_v33, 0.0  ;;  %v1875_v23 = vpack.c.bf16 %v1872_v22, %v1871_v21 }
 0xdbc   :  { %2329 = vpow2.f32 %v1678_v28  ;;  %1681 = vadd.xlane.f32.xlu0 %v1680_v29 }
 0xdbe   :  { %v2326_v35 = vpop.eup %2325 }
 0xdbf   :  { %v1502_v30 = vsel %vm227_vm6, %v2326_v35, 0.0 }
 0xdc0   :  { %1416 = vadd.xlane.f32.xlu0 %v1415_v34 }
 0xdc2   :  { %v2328_v40 = vpop.eup %2327 }
 0xdc3   :  { %v1593_v36 = vsel %vm227_vm6, %v2328_v40, 0.0 }
 0xdc4   :  { %1503 = vadd.xlane.f32.xlu0 %v1502_v30 }
 0xdc6   :  { %v2330_v31 = vpop.eup %2329 }
 0xdc7   :  { %v1683_v32 = vsel %vm227_vm6, %v2330_v31, 0.0 }
 0xdc8   :  { %1684 = vadd.xlane.f32.xlu1 %v1683_v32  ;;  %1594 = vadd.xlane.f32.xlu0 %v1593_v36 }
 0xdd9   :  { %1691 = vrot.lane.b32.xlu1 %v2790_v60, %s2357_s28 }
 0xdde   :  { %1511 = vrot.lane.b32.xlu0 %v2790_v60, %s2356_s1 }
 0xe3d   :  { %v1414_v37 = vpop.xlane.xlu0 %1413 }
 0xe3e   :  { %2331 = vrcp.f32 %v1414_v37 }
 0xe41   :  { %v1501_v38 = vpop.xlane.xlu0 %1500 }
 0xe45   :  { %v1592_v39 = vpop.xlane.xlu0 %1591 }
 0xe48   :  { %v2332_v48 = vpop.eup %2331 }
 0xe49   :  { %v1682_v41 = vpop.xlane.xlu0 %1681  ;;  %v1420_v60 = vmul.f32 %v2332_v48, %v2316_v14 }
 0xe4d   :  { %v1417_v42 = vpop.xlane.xlu0 %1416 }
 0xe4e   :  { %2333 = vrcp.f32 %v1417_v42 }
 0xe4f   :  { %2335 = vrcp.f32 %v1501_v38 }
 0xe51   :  { %v1504_v45 = vpop.xlane.xlu0 %1503 }
 0xe52   :  { %2337 = vrcp.f32 %v1504_v45 }
 0xe53   :  { %2339 = vrcp.f32 %v1592_v39 }
 0xe55   :  { %v1685_v46 = vpop.xlane.xlu1 %1684  ;;  %v1595_v47 = vpop.xlane.xlu0 %1594 }
 0xe56   :  { %2341 = vrcp.f32 %v1685_v46 }
 0xe57   :  { %2343 = vrcp.f32 %v1595_v47 }
 0xe58   :  { %v2334_v49 = vpop.eup %2333  ;;  %2345 = vrcp.f32 %v1682_v41 }
 0xe59   :  { %v1421_v50 = vmul.f32 %v2334_v49, %v2324_v33  ;;  %v1512_v51 = vpop.permute.xlu0 %1511  ;;  %v2336_v52 = vpop.eup %2335 }
 0xe5a   :  { %2171 = vmatpush3.bf16.msra.mxu1 %v1512_v51  ;;  %v1507_v53 = vmul.f32 %v2336_v52, %v2318_v24  ;;  %v1692_v1 = vpop.permute.xlu1 %1691 }
 0xe5b   :  { %v1422_v55 = vpack.c.bf16 %v1421_v50, %v1420_v60  ;;  %2182 = vmatprep.subr.bf16.mxu1 %v2349_v0 }
 0xe5c   :  { %v2338_v43 = vpop.eup %2337 }
 0xe5d   :  { %v1508_v56 = vmul.f32 %v2338_v43, %v2326_v35  ;;  %2167 = vmatmul.mubr.msk.bf16.vlgmr.msra.gmra.mrb[28].mxu0 %vm227_vm6, %v1422_v55  ;;  %v2340_v57 = vpop.eup %2339  ;;  %v2014_v35 = vld [vmem:[%s2935_s11] ss:$0 sm:$0xff] }
 0xe5e   :  { %2177 = vmatpush3.bf16.msra.mxu0 %v1602_v44  ;;  %2178 = vmatprep.mubr.msk.bf16.mxu0 %vm2350_vm1, %v2349_v0  ;;  %v1598_v62 = vmul.f32 %v2340_v57, %v2828_v19 }
 0xe5f   :  { %v1509_v59 = vpack.c.bf16 %v1508_v56, %v1507_v53  ;;  %2188 = vmatprep.subr.bf16.mxu0 %v2349_v0 }
 0xe60   :  { %v2342_v58 = vpop.eup %2341 }
 0xe61   :  { %v2344_v61 = vpop.eup %2343  ;;  %2173 = vmatmul.mubr.msk.bf16.vlgmr.msra.gmra.mrb[28].mxu1 %vm227_vm6, %v1509_v59  ;;  %v1689_v3 = vmul.f32 %v2342_v58, %v2330_v31 }
 0xe62   :  { %v1599_v63 = vmul.f32 %v2344_v61, %v2328_v40  ;;  %v2346_v2 = vpop.eup %2345  ;;  %2183 = vmatpush3.bf16.msra.mxu1 %v1692_v1  ;;  %2184 = vmatprep.mubr.msk.bf16.mxu1 %vm2350_vm1, %v2349_v0 }
 0xe63   :  { %2194 = vmatprep.subr.bf16.mxu1 %v2349_v0  ;;  %v1688_v5 = vmul.f32 %v2346_v2, %v2832_v27 }
 0xe64   :  { %v1600_v4 = vpack.c.bf16 %v1599_v63, %v1598_v62 }
 0xe65   :  { %v1690_v13 = vpack.c.bf16 %v1689_v3, %v1688_v5 }
 0xe66   :  { %2179 = vmatmul.mubr.msk.bf16.vlgmr.msra.gmra.mrb[32].mxu0 %vm227_vm6, %v1600_v4 }
 0xe67   :  { %2190 = vmatprep.mubr.msk.bf16.mxu0 %vm2350_vm1, %v2349_v0 }
 0xe69   :  { %2185 = vmatmul.mubr.msk.bf16.vlgmr.msra.gmra.mrb[32].mxu1 %vm227_vm6, %v1690_v13 }
 0xe6a   :  { %2198 = vmatprep.mubr.msk.bf16.mxu1 %vm2350_vm1, %v2349_v0  ;;  %2195 = vmatpush3.bf16.msra.mxu1 %v1875_v23  ;;  %v1873_v23 = vld [vmem:[%s2934_s13 + $0x10] sm:$0xff] }
 0xe6b   :  { %2196 = vmatprep.subr.bf16.mxu1 %v2349_v0 }
 0xf30   :  { %v1460_v6 = vpop.f32.mrb[28].mxu0 }
 0xf31   :  { %v2168_v7 = vpop.f32.mrb[29].mxu0 }
 0xf32   :  { %v1463_v54 = vpop.f32.mrb[30].mxu0 }
 0xf33   :  { %v2169_v8 = vpop.f32.mrb[31].mxu0 }
 0xf34   :  { %v1551_v14 = vpop.f32.mrb[28].mxu1 }
 0xf35   :  { %1740 = vrot.lane.b32.xlu0 %v1551_v14, %s2360_s2  ;;  %v2174_v9 = vpop.f32.mrb[29].mxu1 }
 0xf36   :  { %v1554_v10 = vpop.f32.mrb[30].mxu1  ;;  %v2016_v9 = vld [vmem:[%s2935_s11 + $0x2] ss:$0 sm:$0xff] }
 0xf37   :  { %1742 = vrot.lane.b32.xlu1 %v1554_v10, %s2360_s2  ;;  %v2175_v25 = vpop.f32.mrb[31].mxu1 }
 0xf39   :  { %v1641_v11 = vpop.f32.mrb[32].mxu0 }
 0xf3a   :  { %1748 = vrot.lane.b32.xlu0 %v1641_v11, %s2361_s0  ;;  %v2180_v24 = vpop.f32.mrb[33].mxu0  ;;  %v1929_v11 = vld [vmem:[%s2936_s15] sm:$0xff] }
 0xf3b   :  { %v1644_v12 = vpop.f32.mrb[34].mxu0 }
 0xf3c   :  { %1750 = vrot.lane.b32.xlu1 %v1644_v12, %s2361_s0  ;;  %v2181_v15 = vpop.f32.mrb[35].mxu0  ;;  %v1731_v16 = vpop.f32.mrb[32].mxu1 }
 0xf3d   :  { %v2186_v17 = vpop.f32.mrb[33].mxu1 }
 0xf3e   :  { %1756 = vrot.lane.b32.xlu0 %v1731_v16, %s2362_s20  ;;  %v1734_v19 = vpop.f32.mrb[34].mxu1  ;;  %v1824_v17 = vld [vmem:[%s2937_s12] sm:$0x3] }
 0xf3f   :  { %v2187_v20 = vpop.f32.mrb[35].mxu1  ;;  %v1825_v21 = vpack.c.bf16 %v1824_v17, %v1824_v17 }
 0xf40   :  { %1758 = vrot.lane.b32.xlu1 %v1734_v19, %s2362_s20  ;;  %v1930_v19 = vpack.c.bf16 %v1929_v11, %v1929_v11 }
 0xf42   :  { %v1942_v22 = vsel %vm76_vm0, %v1930_v19, 0 }
 0xfa7   :  { %v1741_v27 = vpop.permute.xlu0 %1740 }
 0xfa8   :  { %v1762_v34 = vsel %vm72_vm2, %v1460_v6, %v1741_v27  ;;  %v1874_v27 = vld [vmem:[%s2934_s13 + $0x18] sm:$0xff] }
 0xfa9   :  { %v1743_v28 = vpop.permute.xlu1 %1742 }
 0xfaa   :  { %v1763_v31 = vsel %vm72_vm2, %v1463_v54, %v1743_v28  ;;  %v2015_v54 = vld [vmem:[%s2935_s11 + $0x1] ss:$0 sm:$0xff]  ;;  %v1876_v28 = vpack.c.bf16 %v1874_v27, %v1873_v23 }
 0xfac   :  { %v1749_v29 = vpop.permute.xlu0 %1748  ;;  %2197 = vmatpush3.bf16.msra.mxu1 %v1876_v28 }
 0xfad   :  { %v1764_v30 = vsel %vm227_vm6, %v1762_v34, %v1749_v29 }
 0xfae   :  { %v1751_v33 = vpop.permute.xlu1 %1750 }
 0xfaf   :  { %v1765_v36 = vsel %vm227_vm6, %v1763_v31, %v1751_v33 }
 0xfb0   :  { %v1757_v40 = vpop.permute.xlu0 %1756 }
 0xfb1   :  { %v1766_v32 = vsel %vm594_vm7, %v1764_v30, %v1757_v40  ;;  %v2018_v40 = vld [vmem:[%s2939_s14] ss:$0 sm:$0xff] }
 0xfb2   :  { %v1775_v37 = vadd.f32 %v2014_v35, %v1766_v32  ;;  %v1759_v38 = vpop.permute.xlu1 %1758 }
 0xfb3   :  { %v1767_v39 = vsel %vm594_vm7, %v1765_v36, %v1759_v38 }
 0xfb4   :  { %v1777_v41 = vmul.f32 %v1775_v37, %v2624_v18  ;;  %v1776_v42 = vadd.f32 %v2014_v35, %v1767_v39 }
 0xfb6   :  { %v1789_v44 = vmul.f32 %v1777_v41, %v1777_v41  ;;  %v1778_v45 = vmul.f32 %v1776_v42, %v2626_v26  ;;  %v1779_v46 = vsel %vm128_vm3, %v1777_v41, 0.0 }
 0xfb8   :  { %v1780_v47 = vsel %vm128_vm3, %v1778_v45, 0.0  ;;  %v1790_v48 = vmul.f32 %v1778_v45, %v1778_v45  ;;  %v1791_v60 = vsel %vm128_vm3, %v1789_v44, 0.0 }
 0xfb9   :  { %v1781_v49 = vadd.f32 %v1780_v47, %v1779_v46 }
 0xfba   :  { %v1792_v50 = vsel %vm128_vm3, %v1790_v48, 0.0 }
 0xfbb   :  { %v1782_v51 = vrot.slane %v1781_v49, 4  ;;  %v1793_v52 = vadd.f32 %v1792_v50, %v1791_v60 }
 0xfbd   :  { %v1783_v55 = vadd.f32 %v1782_v51, %v1781_v49  ;;  %v1794_v43 = vrot.slane %v1793_v52, 4 }
 0xfbf   :  { %v1784_v53 = vrot.slane %v1783_v55, 2  ;;  %v1795_v18 = vadd.f32 %v1794_v43, %v1793_v52 }
 0xfc1   :  { %v1785_v56 = vadd.f32 %v1784_v53, %v1783_v55  ;;  %v1796_v57 = vrot.slane %v1795_v18, 2 }
 0xfc3   :  { %v1786_v58 = vrot.slane %v1785_v56, 1  ;;  %v1797_v26 = vadd.f32 %v1796_v57, %v1795_v18 }
 0xfc5   :  { %v1787_v59 = vadd.f32 %v1786_v58, %v1785_v56  ;;  %v1798_v61 = vrot.slane %v1797_v26, 1 }
 0xfc7   :  { %v1788_v62 = vmul.f32 0.0625, %v1787_v59  ;;  %v1799_v63 = vadd.f32 %v1798_v61, %v1797_v26 }
 0xfc9   :  { %v1800_v1 = vmul.f32 0.0625, %v1799_v63  ;;  %v1801_v2 = vmul.f32 %v1788_v62, %v1788_v62  ;;  %v1805_v3 = vsub.f32 %v1778_v45, %v1788_v62  ;;  %v1804_v4 = vsub.f32 %v1777_v41, %v1788_v62 }
 0xfcb   :  { %v1802_v5 = vsub.f32 %v1800_v1, %v1801_v2 }
 0xfcd   :  { %v1803_v13 = vmax.f32 %v1802_v5, 0.0 }
 0xfcf   :  { %v1806_v6 = vadd.f32 1e-05, %v1803_v13 }
 0xfd1   :  { %2347 = vrsqrt.f32 %v1806_v6 }
 0xfdb   :  { %v2348_v7 = vpop.eup %2347 }
 0xfdc   :  { %v1809_v8 = vmul.f32 %v2348_v7, %v1805_v3  ;;  %v1808_v14 = vmul.f32 %v2348_v7, %v1804_v4 }
 0xfde   :  { %v1814_v10 = vmul.f32 %v2015_v54, %v1808_v14  ;;  %v1815_v25 = vmul.f32 %v2015_v54, %v1809_v8 }
 0xfe0   :  { %v1820_v24 = vadd.f32 %v2016_v9, %v1814_v10  ;;  %v1821_v12 = vadd.f32 %v2016_v9, %v1815_v25 }
 0xfe2   :  { %v1822_v15 = vmax.f32 %v1820_v24, 0.0  ;;  %v1823_v16 = vmax.f32 %v1821_v12, 0.0 }
 0xfe4   :  { %v1826_v20 = vpack.c.bf16 %v1823_v16, %v1822_v15 }
 0xfe6   :  { %2189 = vmatpush3.bf16.msra.mxu0 %v1826_v20 }
 0xfe7   :  { %2202 = vmatprep.subr.bf16.mxu0 %v2349_v0 }
 0xfe9   :  { %2191 = vmatmul.mubr.msk.bf16.vlgmr.msra.gmra.mrb[36].mxu0 %vm227_vm6, %v1825_v21 }
 0xfea   :  { %2203 = vmatpush3.bf16.msra.mxu0 %v1942_v22  ;;  %2204 = vmatprep.mubr.msk.bf16.mxu0 %vm2350_vm1, %v2349_v0  ;;  %v22_v0 = vstv %s2938_s16 }
 0xfeb   :  { %23 = vst [vmem:[#allocation2] sm:$0x1] %v22_v0 }
 0xff2   :  { %v2020_v42 = vld [vmem:[#allocation2] ss:$0 sm:$0xff] }
0x10bc   :  { %v1864_v29 = vpop.f32.mrb[36].mxu0 }
0x10bd   :  { %v1870_v33 = vpack.c.bf16 %v1864_v29, %v1864_v29  ;;  %v2192_v34 = vpop.f32.mrb[37].mxu0 }
0x10be   :  { %v1867_v35 = vpop.f32.mrb[38].mxu0 }
0x10bf   :  { %v2193_v30 = vpop.f32.mrb[39].mxu0  ;;  %2199 = vmatmul.mubr.msk.bf16.vlgmr.msra.gmra.mrb[36].mxu1 %vm128_vm3, %v1870_v33 }
0x1192   :  { %v1921_v31 = vpop.f32.mrb[36].mxu1 }
0x1193   :  { %v1922_v32 = vadd.f32 %v2018_v40, %v1921_v31  ;;  %v2200_v36 = vpop.f32.mrb[37].mxu1 }
0x1194   :  { %v1924_v37 = vpop.f32.mrb[38].mxu1 }
0x1195   :  { %v1927_v38 = vmax.f32 %v1922_v32, 0.0  ;;  %v2201_v39 = vpop.f32.mrb[39].mxu1 }
0x1197   :  { %v1928_v41 = vpack.c.bf16 %v1927_v38, %v1927_v38 }
0x1199   :  { %2205 = vmatmul.mubr.msk.bf16.vlgmr.msra.gmra.mrb[40].mxu0 %vm72_vm2, %v1928_v41 }
0x126c   :  { %v1978_v44 = vpop.f32.mrb[40].mxu0 }
0x126d   :  { %v1979_v45 = vadd.f32 %v2020_v42, %v1978_v44  ;;  %v2206_v46 = vpop.f32.mrb[41].mxu0 }
0x126e   :  { %v1981_v47 = vpop.f32.mrb[42].mxu0 }
0x126f   :  { %1985 = vst.msk [vmem:[%s2940_s17] sm:$0x3] %vm1984_vm8, %v1979_v45  ;;  %v2207_v48 = vpop.f32.mrb[43].mxu0 }

</bundles_post_ra>
